<compile_context>
chip_gen: v6e
topology: v6e:2x2x1
jax: 0.10.0
libtpu: 0.0.40
codegen_flags: <defaults>
</compile_context>

<pallas_src>
import jax
import jax.numpy as jnp
from jax import lax
from jax.experimental import pallas as pl
from jax.experimental.pallas import tpu as pltpu

EPS = 1e-5


def _fused_kernel(x_ref, p_ref, o_ref):
    N, C, H, W = x_ref.shape
    Ho, Wo = H - 1, W - 1                       # conv1 2x2, stride 1, VALID
    Po, Pw = o_ref.shape[2], o_ref.shape[3]     # maxpool 2x2 stride 2 (floor)

    # ------------- packed-parameter offsets (single SMEM blob) --------------
    W1_OFF = 0                       # (C, C, 2, 2) flattened [co, ci, kh, kw]
    W2_OFF = W1_OFF + C * C * 4      # (C, C) flattened [co, ci]
    B1_OFF = W2_OFF + C * C
    G1_OFF = B1_OFF + C
    BE1_OFF = G1_OFF + C
    B2_OFF = BE1_OFF + C
    G2_OFF = B2_OFF + C
    BE2_OFF = G2_OFF + C

    def cvec(off):
        # Per-channel parameter as a (1, C, 1, 1) vector built from SMEM scalars.
        return jnp.concatenate(
            [jnp.full((1, 1, 1, 1), p_ref[off + c], dtype=jnp.float32)
             for c in range(C)], axis=1)

    def bn_stats(z, inv_m):
        # Fused per-channel sum & sum-of-squares: one staged reduction over
        # the concatenated [z, z*z] block (halves XLU reduce sequences).
        zz = jnp.concatenate([z, z * z], axis=1)          # (N, 2C, h, w)
        s = jnp.sum(zz, axis=-1, keepdims=True)
        s = jnp.sum(s, axis=-2, keepdims=True)
        s = jnp.sum(s, axis=0, keepdims=True)             # (1, 2C, 1, 1)
        mean = s[:, 0:C] * inv_m
        var = s[:, C:2 * C] * inv_m - mean * mean
        return mean, var

    x = x_ref[...]                                        # (N, C, H, W) f32

    # ---------------- stage 1: softmax over W and u = a*(1+x) ----------------
    m = jnp.max(x, axis=-1, keepdims=True)
    e = jnp.exp(x - m)
    s = jnp.sum(e, axis=-1, keepdims=True)
    r = pl.reciprocal(s, approx=True)          # EUP reciprocal (off the VALU)
    r = r * (2.0 - s * r)                      # one NR step: margin vs 2e-3 tol
    a = e * r
    u = a * (1.0 + x)                          # == a + x*a

    # ------- stage 2: conv1 (VPU contraction) + bias + BN1 + residual --------
    # Hoist the 12 shifted windows once (reused by every output channel).
    wins = {}
    for ci in range(C):
        for kh in range(2):
            for kw in range(2):
                wins[(ci, kh, kw)] = u[:, ci:ci + 1, kh:kh + Ho, kw:kw + Wo]

    y_parts = []
    for co in range(C):
        acc = None
        for ci in range(C):
            for kh in range(2):
                for kw in range(2):
                    w_s = p_ref[W1_OFF + ((co * C + ci) * 2 + kh) * 2 + kw]
                    t = wins[(ci, kh, kw)] * w_s
                    acc = t if acc is None else acc + t
        y_parts.append(acc)
    y = jnp.concatenate(y_parts, axis=1) + cvec(B1_OFF)   # (N, C, Ho, Wo)

    inv_m1 = 1.0 / float(N * Ho * Wo)
    mean1, var1 = bn_stats(y, inv_m1)
    scale1 = cvec(G1_OFF) * lax.rsqrt(var1 + EPS)
    shift1 = cvec(BE1_OFF) - mean1 * scale1
    # TODO(synk): PyTorch `v1 + x1` mismatches spatially; top-left crop of x.
    v1 = y * scale1 + shift1 + x[:, :, 0:Ho, 0:Wo]        # (N, C, Ho, Wo)

    # -------- stage 3: maxpool 2x2 stride 2, vectorized over (N, C) ----------
    rows = [jnp.maximum(v1[:, :, 2 * i:2 * i + 1, :],
                        v1[:, :, 2 * i + 1:2 * i + 2, :]) for i in range(Po)]
    rmax = jnp.concatenate(rows, axis=-2)                 # (N, C, Po, Wo)
    cols = [jnp.maximum(rmax[:, :, :, 2 * j:2 * j + 1],
                        rmax[:, :, :, 2 * j + 1:2 * j + 2]) for j in range(Pw)]
    mp = jnp.concatenate(cols, axis=-1)                   # (N, C, Po, Pw)

    # ---------------------- BN2 (training-mode batch stats) ------------------
    inv_m2 = 1.0 / float(N * Po * Pw)
    mean2, var2 = bn_stats(mp, inv_m2)
    scale2 = cvec(G2_OFF) * lax.rsqrt(var2 + EPS)
    shift2 = cvec(BE2_OFF) - mean2 * scale2
    bn2 = mp * scale2 + shift2                            # (N, C, Po, Pw)

    # ------ stage 4: conv2 1x1 (padding=1) top-left crop, * a, + bn2(mp) -----
    # cropped conv2[:, co, i, j] = b2[co] + sum_ci w2[co,ci]*mp[:,ci,i-1,j-1]
    # for i,j >= 1, and b2[co] on the zero-padded border row/column.
    t_parts = []
    for co in range(C):
        acc = None
        for ci in range(C):
            w_s = p_ref[W2_OFF + co * C + ci]
            term = mp[:, ci:ci + 1, :, :] * w_s
            acc = term if acc is None else acc + term
        t_parts.append(acc)
    t = jnp.concatenate(t_parts, axis=1)                  # (N, C, Po, Pw)

    inner = t[:, :, 0:Po - 1, 0:Pw - 1]                   # shift by (+1, +1)
    left = jnp.zeros((N, C, Po - 1, 1), jnp.float32)
    top = jnp.zeros((N, C, 1, Pw), jnp.float32)
    shifted = jnp.concatenate(
        [top, jnp.concatenate([left, inner], axis=-1)], axis=-2)
    c2 = shifted + cvec(B2_OFF)

    # TODO(synk): `v2 * a` / `v2 + bn2(mp)` mismatch in PyTorch; top-left crop.
    v3 = c2 * a[:, :, 0:Po, 0:Pw] + bn2

    o_ref[...] = v3                                       # single full store


# --------------------------------- wrapper -----------------------------------
def model_forward(x, p):
    N, C, H, W = x.shape
    Ho, Wo = H - 1, W - 1
    Po, Pw = (Ho - 2) // 2 + 1, (Wo - 2) // 2 + 1

    # Pack all parameters into one flat f32 SMEM blob (2 input DMAs total).
    params_flat = jnp.concatenate([
        p["w1"].reshape(-1), p["w2"].reshape(-1),
        p["b1"], p["g1"], p["be1"],
        p["b2"], p["g2"], p["be2"],
    ]).astype(jnp.float32)

    vmem = pl.BlockSpec(memory_space=pltpu.MemorySpace.VMEM)
    smem = pl.BlockSpec(memory_space=pltpu.MemorySpace.SMEM)

    return pl.pallas_call(
        _fused_kernel,
        out_shape=jax.ShapeDtypeStruct((N, C, Po, Pw), jnp.float32),
        in_specs=[vmem, smem],
        out_specs=vmem,
    )(x, params_flat)


# --------------------------- pure-JAX reference -------------------------------
def reference_forward(x, p):
    dn = ("NCHW", "OIHW", "NCHW")

    def bn(y, g, b):
        mean = jnp.mean(y, axis=(0, 2, 3), keepdims=True)
        var = jnp.mean((y - mean) ** 2, axis=(0, 2, 3), keepdims=True)
        return ((y - mean) / jnp.sqrt(var + EPS) * g[None, :, None, None]
                + b[None, :, None, None])

    a = jax.nn.softmax(x, axis=3)
    u = a + x * a
    c1 = lax.conv_general_dilated(u, p["w1"], (1, 1), "VALID",
                                  dimension_numbers=dn)
    c1 = c1 + p["b1"][None, :, None, None]
    v1 = bn(c1, p["g1"], p["be1"]) + x[:, :, :c1.shape[2], :c1.shape[3]]
    mp = lax.reduce_window(v1, -jnp.inf, lax.max, (1, 1, 2, 2), (1, 1, 2, 2),
                           "VALID")
    c2 = lax.conv_general_dilated(mp, p["w2"], (1, 1), ((1, 1), (1, 1)),
                                  dimension_numbers=dn)
    c2 = c2 + p["b2"][None, :, None, None]
    v2 = c2 * a[:, :, :c2.shape[2], :c2.shape[3]]
    b2o = bn(mp, p["g2"], p["be2"])
    return v2[:, :, :b2o.shape[2], :b2o.shape[3]] + b2o


if __name__ == "__main__":
    key = jax.random.PRNGKey(0)
    kx, k1, k2, k3, k4, k5, k6, k7, k8 = jax.random.split(key, 9)
    N, C, H, W = 2, 3, 8, 8
    x = jax.random.normal(kx, (N, C, H, W), jnp.float32)
    params = dict(
        w1=0.3 * jax.random.normal(k1, (C, C, 2, 2), jnp.float32),
        b1=0.1 * jax.random.normal(k2, (C,), jnp.float32),
        g1=1.0 + 0.1 * jax.random.normal(k3, (C,), jnp.float32),
        be1=0.1 * jax.random.normal(k4, (C,), jnp.float32),
        w2=0.3 * jax.random.normal(k5, (C, C, 1, 1), jnp.float32),
        b2=0.1 * jax.random.normal(k6, (C,), jnp.float32),
        g2=1.0 + 0.1 * jax.random.normal(k7, (C,), jnp.float32),
        be2=0.1 * jax.random.normal(k8, (C,), jnp.float32),
    )

    out = jax.jit(model_forward)(x, params)
    out = jax.block_until_ready(out)

    ref = reference_forward(x, params)
    assert out.shape == ref.shape, (out.shape, ref.shape)
    if not jnp.allclose(out, ref, rtol=2e-3, atol=2e-3):
        raise AssertionError("Pallas result does not match JAX reference")
    print("KERNEL_OK")
</pallas_src>

<mosaic_0001>
module attributes {stable_mosaic.version = 11 : i64} {
  func.func @_fused_kernel(%arg0: memref<2x3x8x8xf32, #tpu.memory_space<vmem>>, %arg1: memref<63xf32, #tpu.memory_space<smem>>, %arg2: memref<2x3x3x3xf32, #tpu.memory_space<vmem>>) attributes {dimension_semantics = [], scalar_prefetch = 0 : i64, scratch_operands = 0 : i64, tpu.core_type = #tpu.core_type<tc>} {
    %c0 = arith.constant 0 : index
    %c0_0 = arith.constant 0 : index
    %c0_1 = arith.constant 0 : index
    %c0_2 = arith.constant 0 : index
    %0 = vector.load %arg0[%c0, %c0_0, %c0_1, %c0_2] : memref<2x3x8x8xf32, #tpu.memory_space<vmem>>, vector<2x3x8x8xf32>
    %cst = arith.constant dense<0xFF800000> : vector<2x3x8xf32>
    %1 = vector.multi_reduction <maximumf>, %0, %cst [3] : vector<2x3x8x8xf32> to vector<2x3x8xf32>
    %2 = vector.shape_cast %1 : vector<2x3x8xf32> to vector<2x3x8x1xf32>
    %3 = vector.broadcast %2 : vector<2x3x8x1xf32> to vector<2x3x8x8xf32>
    %4 = arith.subf %0, %3 : vector<2x3x8x8xf32>
    %5 = math.exp %4 : vector<2x3x8x8xf32>
    %cst_3 = arith.constant dense<0.000000e+00> : vector<2x3x8xf32>
    %6 = vector.multi_reduction <add>, %5, %cst_3 [3] : vector<2x3x8x8xf32> to vector<2x3x8xf32>
    %7 = vector.shape_cast %6 : vector<2x3x8xf32> to vector<2x3x8x1xf32>
    %8 = tpu.reciprocal %7 {approx = true} : vector<2x3x8x1xf32> -> vector<2x3x8x1xf32>
    %9 = arith.mulf %7, %8 : vector<2x3x8x1xf32>
    %cst_4 = arith.constant 2.000000e+00 : f32
    %10 = vector.broadcast %cst_4 : f32 to vector<2x3x8x1xf32>
    %11 = arith.subf %10, %9 : vector<2x3x8x1xf32>
    %12 = arith.mulf %8, %11 : vector<2x3x8x1xf32>
    %13 = vector.broadcast %12 : vector<2x3x8x1xf32> to vector<2x3x8x8xf32>
    %14 = arith.mulf %5, %13 : vector<2x3x8x8xf32>
    %cst_5 = arith.constant 1.000000e+00 : f32
    %15 = vector.broadcast %cst_5 : f32 to vector<2x3x8x8xf32>
    %16 = arith.addf %15, %0 : vector<2x3x8x8xf32>
    %17 = arith.mulf %14, %16 : vector<2x3x8x8xf32>
    %18 = vector.extract_strided_slice %17 {offsets = [0, 0, 0, 0], sizes = [2, 1, 7, 7], strides = [1, 1, 1, 1]} : vector<2x3x8x8xf32> to vector<2x1x7x7xf32>
    %19 = vector.extract_strided_slice %17 {offsets = [0, 0, 0, 1], sizes = [2, 1, 7, 7], strides = [1, 1, 1, 1]} : vector<2x3x8x8xf32> to vector<2x1x7x7xf32>
    %20 = vector.extract_strided_slice %17 {offsets = [0, 0, 1, 0], sizes = [2, 1, 7, 7], strides = [1, 1, 1, 1]} : vector<2x3x8x8xf32> to vector<2x1x7x7xf32>
    %21 = vector.extract_strided_slice %17 {offsets = [0, 0, 1, 1], sizes = [2, 1, 7, 7], strides = [1, 1, 1, 1]} : vector<2x3x8x8xf32> to vector<2x1x7x7xf32>
    %22 = vector.extract_strided_slice %17 {offsets = [0, 1, 0, 0], sizes = [2, 1, 7, 7], strides = [1, 1, 1, 1]} : vector<2x3x8x8xf32> to vector<2x1x7x7xf32>
    %23 = vector.extract_strided_slice %17 {offsets = [0, 1, 0, 1], sizes = [2, 1, 7, 7], strides = [1, 1, 1, 1]} : vector<2x3x8x8xf32> to vector<2x1x7x7xf32>
    %24 = vector.extract_strided_slice %17 {offsets = [0, 1, 1, 0], sizes = [2, 1, 7, 7], strides = [1, 1, 1, 1]} : vector<2x3x8x8xf32> to vector<2x1x7x7xf32>
    %25 = vector.extract_strided_slice %17 {offsets = [0, 1, 1, 1], sizes = [2, 1, 7, 7], strides = [1, 1, 1, 1]} : vector<2x3x8x8xf32> to vector<2x1x7x7xf32>
    %26 = vector.extract_strided_slice %17 {offsets = [0, 2, 0, 0], sizes = [2, 1, 7, 7], strides = [1, 1, 1, 1]} : vector<2x3x8x8xf32> to vector<2x1x7x7xf32>
    %27 = vector.extract_strided_slice %17 {offsets = [0, 2, 0, 1], sizes = [2, 1, 7, 7], strides = [1, 1, 1, 1]} : vector<2x3x8x8xf32> to vector<2x1x7x7xf32>
    %28 = vector.extract_strided_slice %17 {offsets = [0, 2, 1, 0], sizes = [2, 1, 7, 7], strides = [1, 1, 1, 1]} : vector<2x3x8x8xf32> to vector<2x1x7x7xf32>
    %29 = vector.extract_strided_slice %17 {offsets = [0, 2, 1, 1], sizes = [2, 1, 7, 7], strides = [1, 1, 1, 1]} : vector<2x3x8x8xf32> to vector<2x1x7x7xf32>
    %c0_6 = arith.constant 0 : index
    %30 = memref.load %arg1[%c0_6] : memref<63xf32, #tpu.memory_space<smem>>
    %31 = vector.broadcast %30 : f32 to vector<2x1x7x7xf32>
    %32 = arith.mulf %18, %31 : vector<2x1x7x7xf32>
    %c1 = arith.constant 1 : index
    %33 = memref.load %arg1[%c1] : memref<63xf32, #tpu.memory_space<smem>>
    %34 = vector.broadcast %33 : f32 to vector<2x1x7x7xf32>
    %35 = arith.mulf %19, %34 : vector<2x1x7x7xf32>
    %36 = arith.addf %32, %35 : vector<2x1x7x7xf32>
    %c2 = arith.constant 2 : index
    %37 = memref.load %arg1[%c2] : memref<63xf32, #tpu.memory_space<smem>>
    %38 = vector.broadcast %37 : f32 to vector<2x1x7x7xf32>
    %39 = arith.mulf %20, %38 : vector<2x1x7x7xf32>
    %40 = arith.addf %36, %39 : vector<2x1x7x7xf32>
    %c3 = arith.constant 3 : index
    %41 = memref.load %arg1[%c3] : memref<63xf32, #tpu.memory_space<smem>>
    %42 = vector.broadcast %41 : f32 to vector<2x1x7x7xf32>
    %43 = arith.mulf %21, %42 : vector<2x1x7x7xf32>
    %44 = arith.addf %40, %43 : vector<2x1x7x7xf32>
    %c4 = arith.constant 4 : index
    %45 = memref.load %arg1[%c4] : memref<63xf32, #tpu.memory_space<smem>>
    %46 = vector.broadcast %45 : f32 to vector<2x1x7x7xf32>
    %47 = arith.mulf %22, %46 : vector<2x1x7x7xf32>
    %48 = arith.addf %44, %47 : vector<2x1x7x7xf32>
    %c5 = arith.constant 5 : index
    %49 = memref.load %arg1[%c5] : memref<63xf32, #tpu.memory_space<smem>>
    %50 = vector.broadcast %49 : f32 to vector<2x1x7x7xf32>
    %51 = arith.mulf %23, %50 : vector<2x1x7x7xf32>
    %52 = arith.addf %48, %51 : vector<2x1x7x7xf32>
    %c6 = arith.constant 6 : index
    %53 = memref.load %arg1[%c6] : memref<63xf32, #tpu.memory_space<smem>>
    %54 = vector.broadcast %53 : f32 to vector<2x1x7x7xf32>
    %55 = arith.mulf %24, %54 : vector<2x1x7x7xf32>
    %56 = arith.addf %52, %55 : vector<2x1x7x7xf32>
    %c7 = arith.constant 7 : index
    %57 = memref.load %arg1[%c7] : memref<63xf32, #tpu.memory_space<smem>>
    %58 = vector.broadcast %57 : f32 to vector<2x1x7x7xf32>
    %59 = arith.mulf %25, %58 : vector<2x1x7x7xf32>
    %60 = arith.addf %56, %59 : vector<2x1x7x7xf32>
    %c8 = arith.constant 8 : index
    %61 = memref.load %arg1[%c8] : memref<63xf32, #tpu.memory_space<smem>>
    %62 = vector.broadcast %61 : f32 to vector<2x1x7x7xf32>
    %63 = arith.mulf %26, %62 : vector<2x1x7x7xf32>
    %64 = arith.addf %60, %63 : vector<2x1x7x7xf32>
    %c9 = arith.constant 9 : index
    %65 = memref.load %arg1[%c9] : memref<63xf32, #tpu.memory_space<smem>>
    %66 = vector.broadcast %65 : f32 to vector<2x1x7x7xf32>
    %67 = arith.mulf %27, %66 : vector<2x1x7x7xf32>
    %68 = arith.addf %64, %67 : vector<2x1x7x7xf32>
    %c10 = arith.constant 10 : index
    %69 = memref.load %arg1[%c10] : memref<63xf32, #tpu.memory_space<smem>>
    %70 = vector.broadcast %69 : f32 to vector<2x1x7x7xf32>
    %71 = arith.mulf %28, %70 : vector<2x1x7x7xf32>
    %72 = arith.addf %68, %71 : vector<2x1x7x7xf32>
    %c11 = arith.constant 11 : index
    %73 = memref.load %arg1[%c11] : memref<63xf32, #tpu.memory_space<smem>>
    %74 = vector.broadcast %73 : f32 to vector<2x1x7x7xf32>
    %75 = arith.mulf %29, %74 : vector<2x1x7x7xf32>
    %76 = arith.addf %72, %75 : vector<2x1x7x7xf32>
    %c12 = arith.constant 12 : index
    %77 = memref.load %arg1[%c12] : memref<63xf32, #tpu.memory_space<smem>>
    %78 = vector.broadcast %77 : f32 to vector<2x1x7x7xf32>
    %79 = arith.mulf %18, %78 : vector<2x1x7x7xf32>
    %c13 = arith.constant 13 : index
    %80 = memref.load %arg1[%c13] : memref<63xf32, #tpu.memory_space<smem>>
    %81 = vector.broadcast %80 : f32 to vector<2x1x7x7xf32>
    %82 = arith.mulf %19, %81 : vector<2x1x7x7xf32>
    %83 = arith.addf %79, %82 : vector<2x1x7x7xf32>
    %c14 = arith.constant 14 : index
    %84 = memref.load %arg1[%c14] : memref<63xf32, #tpu.memory_space<smem>>
    %85 = vector.broadcast %84 : f32 to vector<2x1x7x7xf32>
    %86 = arith.mulf %20, %85 : vector<2x1x7x7xf32>
    %87 = arith.addf %83, %86 : vector<2x1x7x7xf32>
    %c15 = arith.constant 15 : index
    %88 = memref.load %arg1[%c15] : memref<63xf32, #tpu.memory_space<smem>>
    %89 = vector.broadcast %88 : f32 to vector<2x1x7x7xf32>
    %90 = arith.mulf %21, %89 : vector<2x1x7x7xf32>
    %91 = arith.addf %87, %90 : vector<2x1x7x7xf32>
    %c16 = arith.constant 16 : index
    %92 = memref.load %arg1[%c16] : memref<63xf32, #tpu.memory_space<smem>>
    %93 = vector.broadcast %92 : f32 to vector<2x1x7x7xf32>
    %94 = arith.mulf %22, %93 : vector<2x1x7x7xf32>
    %95 = arith.addf %91, %94 : vector<2x1x7x7xf32>
    %c17 = arith.constant 17 : index
    %96 = memref.load %arg1[%c17] : memref<63xf32, #tpu.memory_space<smem>>
    %97 = vector.broadcast %96 : f32 to vector<2x1x7x7xf32>
    %98 = arith.mulf %23, %97 : vector<2x1x7x7xf32>
    %99 = arith.addf %95, %98 : vector<2x1x7x7xf32>
    %c18 = arith.constant 18 : index
    %100 = memref.load %arg1[%c18] : memref<63xf32, #tpu.memory_space<smem>>
    %101 = vector.broadcast %100 : f32 to vector<2x1x7x7xf32>
    %102 = arith.mulf %24, %101 : vector<2x1x7x7xf32>
    %103 = arith.addf %99, %102 : vector<2x1x7x7xf32>
    %c19 = arith.constant 19 : index
    %104 = memref.load %arg1[%c19] : memref<63xf32, #tpu.memory_space<smem>>
    %105 = vector.broadcast %104 : f32 to vector<2x1x7x7xf32>
    %106 = arith.mulf %25, %105 : vector<2x1x7x7xf32>
    %107 = arith.addf %103, %106 : vector<2x1x7x7xf32>
    %c20 = arith.constant 20 : index
    %108 = memref.load %arg1[%c20] : memref<63xf32, #tpu.memory_space<smem>>
    %109 = vector.broadcast %108 : f32 to vector<2x1x7x7xf32>
    %110 = arith.mulf %26, %109 : vector<2x1x7x7xf32>
    %111 = arith.addf %107, %110 : vector<2x1x7x7xf32>
    %c21 = arith.constant 21 : index
    %112 = memref.load %arg1[%c21] : memref<63xf32, #tpu.memory_space<smem>>
    %113 = vector.broadcast %112 : f32 to vector<2x1x7x7xf32>
    %114 = arith.mulf %27, %113 : vector<2x1x7x7xf32>
    %115 = arith.addf %111, %114 : vector<2x1x7x7xf32>
    %c22 = arith.constant 22 : index
    %116 = memref.load %arg1[%c22] : memref<63xf32, #tpu.memory_space<smem>>
    %117 = vector.broadcast %116 : f32 to vector<2x1x7x7xf32>
    %118 = arith.mulf %28, %117 : vector<2x1x7x7xf32>
    %119 = arith.addf %115, %118 : vector<2x1x7x7xf32>
    %c23 = arith.constant 23 : index
    %120 = memref.load %arg1[%c23] : memref<63xf32, #tpu.memory_space<smem>>
    %121 = vector.broadcast %120 : f32 to vector<2x1x7x7xf32>
    %122 = arith.mulf %29, %121 : vector<2x1x7x7xf32>
    %123 = arith.addf %119, %122 : vector<2x1x7x7xf32>
    %c24 = arith.constant 24 : index
    %124 = memref.load %arg1[%c24] : memref<63xf32, #tpu.memory_space<smem>>
    %125 = vector.broadcast %124 : f32 to vector<2x1x7x7xf32>
    %126 = arith.mulf %18, %125 : vector<2x1x7x7xf32>
    %c25 = arith.constant 25 : index
    %127 = memref.load %arg1[%c25] : memref<63xf32, #tpu.memory_space<smem>>
    %128 = vector.broadcast %127 : f32 to vector<2x1x7x7xf32>
    %129 = arith.mulf %19, %128 : vector<2x1x7x7xf32>
    %130 = arith.addf %126, %129 : vector<2x1x7x7xf32>
    %c26 = arith.constant 26 : index
    %131 = memref.load %arg1[%c26] : memref<63xf32, #tpu.memory_space<smem>>
    %132 = vector.broadcast %131 : f32 to vector<2x1x7x7xf32>
    %133 = arith.mulf %20, %132 : vector<2x1x7x7xf32>
    %134 = arith.addf %130, %133 : vector<2x1x7x7xf32>
    %c27 = arith.constant 27 : index
    %135 = memref.load %arg1[%c27] : memref<63xf32, #tpu.memory_space<smem>>
    %136 = vector.broadcast %135 : f32 to vector<2x1x7x7xf32>
    %137 = arith.mulf %21, %136 : vector<2x1x7x7xf32>
    %138 = arith.addf %134, %137 : vector<2x1x7x7xf32>
    %c28 = arith.constant 28 : index
    %139 = memref.load %arg1[%c28] : memref<63xf32, #tpu.memory_space<smem>>
    %140 = vector.broadcast %139 : f32 to vector<2x1x7x7xf32>
    %141 = arith.mulf %22, %140 : vector<2x1x7x7xf32>
    %142 = arith.addf %138, %141 : vector<2x1x7x7xf32>
    %c29 = arith.constant 29 : index
    %143 = memref.load %arg1[%c29] : memref<63xf32, #tpu.memory_space<smem>>
    %144 = vector.broadcast %143 : f32 to vector<2x1x7x7xf32>
    %145 = arith.mulf %23, %144 : vector<2x1x7x7xf32>
    %146 = arith.addf %142, %145 : vector<2x1x7x7xf32>
    %c30 = arith.constant 30 : index
    %147 = memref.load %arg1[%c30] : memref<63xf32, #tpu.memory_space<smem>>
    %148 = vector.broadcast %147 : f32 to vector<2x1x7x7xf32>
    %149 = arith.mulf %24, %148 : vector<2x1x7x7xf32>
    %150 = arith.addf %146, %149 : vector<2x1x7x7xf32>
    %c31 = arith.constant 31 : index
    %151 = memref.load %arg1[%c31] : memref<63xf32, #tpu.memory_space<smem>>
    %152 = vector.broadcast %151 : f32 to vector<2x1x7x7xf32>
    %153 = arith.mulf %25, %152 : vector<2x1x7x7xf32>
    %154 = arith.addf %150, %153 : vector<2x1x7x7xf32>
    %c32 = arith.constant 32 : index
    %155 = memref.load %arg1[%c32] : memref<63xf32, #tpu.memory_space<smem>>
    %156 = vector.broadcast %155 : f32 to vector<2x1x7x7xf32>
    %157 = arith.mulf %26, %156 : vector<2x1x7x7xf32>
    %158 = arith.addf %154, %157 : vector<2x1x7x7xf32>
    %c33 = arith.constant 33 : index
    %159 = memref.load %arg1[%c33] : memref<63xf32, #tpu.memory_space<smem>>
    %160 = vector.broadcast %159 : f32 to vector<2x1x7x7xf32>
    %161 = arith.mulf %27, %160 : vector<2x1x7x7xf32>
    %162 = arith.addf %158, %161 : vector<2x1x7x7xf32>
    %c34 = arith.constant 34 : index
    %163 = memref.load %arg1[%c34] : memref<63xf32, #tpu.memory_space<smem>>
    %164 = vector.broadcast %163 : f32 to vector<2x1x7x7xf32>
    %165 = arith.mulf %28, %164 : vector<2x1x7x7xf32>
    %166 = arith.addf %162, %165 : vector<2x1x7x7xf32>
    %c35 = arith.constant 35 : index
    %167 = memref.load %arg1[%c35] : memref<63xf32, #tpu.memory_space<smem>>
    %168 = vector.broadcast %167 : f32 to vector<2x1x7x7xf32>
    %169 = arith.mulf %29, %168 : vector<2x1x7x7xf32>
    %170 = arith.addf %166, %169 : vector<2x1x7x7xf32>
    %171 = tpu.concatenate %76, %123, %170 in 1 : vector<2x1x7x7xf32>, vector<2x1x7x7xf32>, vector<2x1x7x7xf32> -> vector<2x3x7x7xf32>
    %c45 = arith.constant 45 : index
    %172 = memref.load %arg1[%c45] : memref<63xf32, #tpu.memory_space<smem>>
    %173 = vector.broadcast %172 : f32 to vector<1x1x1x1xf32>
    %c46 = arith.constant 46 : index
    %174 = memref.load %arg1[%c46] : memref<63xf32, #tpu.memory_space<smem>>
    %175 = vector.broadcast %174 : f32 to vector<1x1x1x1xf32>
    %c47 = arith.constant 47 : index
    %176 = memref.load %arg1[%c47] : memref<63xf32, #tpu.memory_space<smem>>
    %177 = vector.broadcast %176 : f32 to vector<1x1x1x1xf32>
    %178 = tpu.concatenate %173, %175, %177 in 1 : vector<1x1x1x1xf32>, vector<1x1x1x1xf32>, vector<1x1x1x1xf32> -> vector<1x3x1x1xf32>
    %179 = vector.broadcast %178 : vector<1x3x1x1xf32> to vector<2x3x7x7xf32>
    %180 = arith.addf %171, %179 : vector<2x3x7x7xf32>
    %181 = arith.mulf %180, %180 : vector<2x3x7x7xf32>
    %182 = tpu.concatenate %180, %181 in 1 : vector<2x3x7x7xf32>, vector<2x3x7x7xf32> -> vector<2x6x7x7xf32>
    %cst_7 = arith.constant dense<0.000000e+00> : vector<2x6x7xf32>
    %183 = vector.multi_reduction <add>, %182, %cst_7 [3] : vector<2x6x7x7xf32> to vector<2x6x7xf32>
    %184 = vector.shape_cast %183 : vector<2x6x7xf32> to vector<2x6x7x1xf32>
    %cst_8 = arith.constant dense<0.000000e+00> : vector<2x6x1xf32>
    %185 = vector.multi_reduction <add>, %184, %cst_8 [2] : vector<2x6x7x1xf32> to vector<2x6x1xf32>
    %186 = vector.shape_cast %185 : vector<2x6x1xf32> to vector<2x6x1x1xf32>
    %cst_9 = arith.constant dense<0.000000e+00> : vector<6x1x1xf32>
    %187 = vector.multi_reduction <add>, %186, %cst_9 [0] : vector<2x6x1x1xf32> to vector<6x1x1xf32>
    %188 = vector.shape_cast %187 : vector<6x1x1xf32> to vector<1x6x1x1xf32>
    %189 = vector.extract_strided_slice %188 {offsets = [0, 0, 0, 0], sizes = [1, 3, 1, 1], strides = [1, 1, 1, 1]} : vector<1x6x1x1xf32> to vector<1x3x1x1xf32>
    %cst_10 = arith.constant 0.0102040814 : f32
    %190 = vector.broadcast %cst_10 : f32 to vector<1x3x1x1xf32>
    %191 = arith.mulf %189, %190 : vector<1x3x1x1xf32>
    %192 = vector.extract_strided_slice %188 {offsets = [0, 3, 0, 0], sizes = [1, 3, 1, 1], strides = [1, 1, 1, 1]} : vector<1x6x1x1xf32> to vector<1x3x1x1xf32>
    %cst_11 = arith.constant 0.0102040814 : f32
    %193 = vector.broadcast %cst_11 : f32 to vector<1x3x1x1xf32>
    %194 = arith.mulf %192, %193 : vector<1x3x1x1xf32>
    %195 = arith.mulf %191, %191 : vector<1x3x1x1xf32>
    %196 = arith.subf %194, %195 : vector<1x3x1x1xf32>
    %c48 = arith.constant 48 : index
    %197 = memref.load %arg1[%c48] : memref<63xf32, #tpu.memory_space<smem>>
    %198 = vector.broadcast %197 : f32 to vector<1x1x1x1xf32>
    %c49 = arith.constant 49 : index
    %199 = memref.load %arg1[%c49] : memref<63xf32, #tpu.memory_space<smem>>
    %200 = vector.broadcast %199 : f32 to vector<1x1x1x1xf32>
    %c50 = arith.constant 50 : index
    %201 = memref.load %arg1[%c50] : memref<63xf32, #tpu.memory_space<smem>>
    %202 = vector.broadcast %201 : f32 to vector<1x1x1x1xf32>
    %203 = tpu.concatenate %198, %200, %202 in 1 : vector<1x1x1x1xf32>, vector<1x1x1x1xf32>, vector<1x1x1x1xf32> -> vector<1x3x1x1xf32>
    %cst_12 = arith.constant 9.99999974E-6 : f32
    %204 = vector.broadcast %cst_12 : f32 to vector<1x3x1x1xf32>
    %205 = arith.addf %196, %204 : vector<1x3x1x1xf32>
    %206 = math.rsqrt %205 : vector<1x3x1x1xf32>
    %207 = arith.mulf %203, %206 : vector<1x3x1x1xf32>
    %c51 = arith.constant 51 : index
    %208 = memref.load %arg1[%c51] : memref<63xf32, #tpu.memory_space<smem>>
    %209 = vector.broadcast %208 : f32 to vector<1x1x1x1xf32>
    %c52 = arith.constant 52 : index
    %210 = memref.load %arg1[%c52] : memref<63xf32, #tpu.memory_space<smem>>
    %211 = vector.broadcast %210 : f32 to vector<1x1x1x1xf32>
    %c53 = arith.constant 53 : index
    %212 = memref.load %arg1[%c53] : memref<63xf32, #tpu.memory_space<smem>>
    %213 = vector.broadcast %212 : f32 to vector<1x1x1x1xf32>
    %214 = tpu.concatenate %209, %211, %213 in 1 : vector<1x1x1x1xf32>, vector<1x1x1x1xf32>, vector<1x1x1x1xf32> -> vector<1x3x1x1xf32>
    %215 = arith.mulf %191, %207 : vector<1x3x1x1xf32>
    %216 = arith.subf %214, %215 : vector<1x3x1x1xf32>
    %217 = vector.broadcast %207 : vector<1x3x1x1xf32> to vector<2x3x7x7xf32>
    %218 = arith.mulf %180, %217 : vector<2x3x7x7xf32>
    %219 = vector.broadcast %216 : vector<1x3x1x1xf32> to vector<2x3x7x7xf32>
    %220 = arith.addf %218, %219 : vector<2x3x7x7xf32>
    %221 = vector.extract_strided_slice %0 {offsets = [0, 0, 0, 0], sizes = [2, 3, 7, 7], strides = [1, 1, 1, 1]} : vector<2x3x8x8xf32> to vector<2x3x7x7xf32>
    %222 = arith.addf %220, %221 : vector<2x3x7x7xf32>
    %223 = vector.extract_strided_slice %222 {offsets = [0, 0, 0, 0], sizes = [2, 3, 1, 7], strides = [1, 1, 1, 1]} : vector<2x3x7x7xf32> to vector<2x3x1x7xf32>
    %224 = vector.extract_strided_slice %222 {offsets = [0, 0, 1, 0], sizes = [2, 3, 1, 7], strides = [1, 1, 1, 1]} : vector<2x3x7x7xf32> to vector<2x3x1x7xf32>
    %225 = arith.maximumf %223, %224 : vector<2x3x1x7xf32>
    %226 = vector.extract_strided_slice %222 {offsets = [0, 0, 2, 0], sizes = [2, 3, 1, 7], strides = [1, 1, 1, 1]} : vector<2x3x7x7xf32> to vector<2x3x1x7xf32>
    %227 = vector.extract_strided_slice %222 {offsets = [0, 0, 3, 0], sizes = [2, 3, 1, 7], strides = [1, 1, 1, 1]} : vector<2x3x7x7xf32> to vector<2x3x1x7xf32>
    %228 = arith.maximumf %226, %227 : vector<2x3x1x7xf32>
    %229 = vector.extract_strided_slice %222 {offsets = [0, 0, 4, 0], sizes = [2, 3, 1, 7], strides = [1, 1, 1, 1]} : vector<2x3x7x7xf32> to vector<2x3x1x7xf32>
    %230 = vector.extract_strided_slice %222 {offsets = [0, 0, 5, 0], sizes = [2, 3, 1, 7], strides = [1, 1, 1, 1]} : vector<2x3x7x7xf32> to vector<2x3x1x7xf32>
    %231 = arith.maximumf %229, %230 : vector<2x3x1x7xf32>
    %232 = tpu.concatenate %225, %228, %231 in 2 : vector<2x3x1x7xf32>, vector<2x3x1x7xf32>, vector<2x3x1x7xf32> -> vector<2x3x3x7xf32>
    %233 = vector.extract_strided_slice %232 {offsets = [0, 0, 0, 0], sizes = [2, 3, 3, 1], strides = [1, 1, 1, 1]} : vector<2x3x3x7xf32> to vector<2x3x3x1xf32>
    %234 = vector.extract_strided_slice %232 {offsets = [0, 0, 0, 1], sizes = [2, 3, 3, 1], strides = [1, 1, 1, 1]} : vector<2x3x3x7xf32> to vector<2x3x3x1xf32>
    %235 = arith.maximumf %233, %234 : vector<2x3x3x1xf32>
    %236 = vector.extract_strided_slice %232 {offsets = [0, 0, 0, 2], sizes = [2, 3, 3, 1], strides = [1, 1, 1, 1]} : vector<2x3x3x7xf32> to vector<2x3x3x1xf32>
    %237 = vector.extract_strided_slice %232 {offsets = [0, 0, 0, 3], sizes = [2, 3, 3, 1], strides = [1, 1, 1, 1]} : vector<2x3x3x7xf32> to vector<2x3x3x1xf32>
    %238 = arith.maximumf %236, %237 : vector<2x3x3x1xf32>
    %239 = vector.extract_strided_slice %232 {offsets = [0, 0, 0, 4], sizes = [2, 3, 3, 1], strides = [1, 1, 1, 1]} : vector<2x3x3x7xf32> to vector<2x3x3x1xf32>
    %240 = vector.extract_strided_slice %232 {offsets = [0, 0, 0, 5], sizes = [2, 3, 3, 1], strides = [1, 1, 1, 1]} : vector<2x3x3x7xf32> to vector<2x3x3x1xf32>
    %241 = arith.maximumf %239, %240 : vector<2x3x3x1xf32>
    %242 = tpu.concatenate %235, %238, %241 in 3 : vector<2x3x3x1xf32>, vector<2x3x3x1xf32>, vector<2x3x3x1xf32> -> vector<2x3x3x3xf32>
    %243 = arith.mulf %242, %242 : vector<2x3x3x3xf32>
    %244 = tpu.concatenate %242, %243 in 1 : vector<2x3x3x3xf32>, vector<2x3x3x3xf32> -> vector<2x6x3x3xf32>
    %cst_13 = arith.constant dense<0.000000e+00> : vector<2x6x3xf32>
    %245 = vector.multi_reduction <add>, %244, %cst_13 [3] : vector<2x6x3x3xf32> to vector<2x6x3xf32>
    %246 = vector.shape_cast %245 : vector<2x6x3xf32> to vector<2x6x3x1xf32>
    %cst_14 = arith.constant dense<0.000000e+00> : vector<2x6x1xf32>
    %247 = vector.multi_reduction <add>, %246, %cst_14 [2] : vector<2x6x3x1xf32> to vector<2x6x1xf32>
    %248 = vector.shape_cast %247 : vector<2x6x1xf32> to vector<2x6x1x1xf32>
    %cst_15 = arith.constant dense<0.000000e+00> : vector<6x1x1xf32>
    %249 = vector.multi_reduction <add>, %248, %cst_15 [0] : vector<2x6x1x1xf32> to vector<6x1x1xf32>
    %250 = vector.shape_cast %249 : vector<6x1x1xf32> to vector<1x6x1x1xf32>
    %251 = vector.extract_strided_slice %250 {offsets = [0, 0, 0, 0], sizes = [1, 3, 1, 1], strides = [1, 1, 1, 1]} : vector<1x6x1x1xf32> to vector<1x3x1x1xf32>
    %cst_16 = arith.constant 0.055555556 : f32
    %252 = vector.broadcast %cst_16 : f32 to vector<1x3x1x1xf32>
    %253 = arith.mulf %251, %252 : vector<1x3x1x1xf32>
    %254 = vector.extract_strided_slice %250 {offsets = [0, 3, 0, 0], sizes = [1, 3, 1, 1], strides = [1, 1, 1, 1]} : vector<1x6x1x1xf32> to vector<1x3x1x1xf32>
    %cst_17 = arith.constant 0.055555556 : f32
    %255 = vector.broadcast %cst_17 : f32 to vector<1x3x1x1xf32>
    %256 = arith.mulf %254, %255 : vector<1x3x1x1xf32>
    %257 = arith.mulf %253, %253 : vector<1x3x1x1xf32>
    %258 = arith.subf %256, %257 : vector<1x3x1x1xf32>
    %c57 = arith.constant 57 : index
    %259 = memref.load %arg1[%c57] : memref<63xf32, #tpu.memory_space<smem>>
    %260 = vector.broadcast %259 : f32 to vector<1x1x1x1xf32>
    %c58 = arith.constant 58 : index
    %261 = memref.load %arg1[%c58] : memref<63xf32, #tpu.memory_space<smem>>
    %262 = vector.broadcast %261 : f32 to vector<1x1x1x1xf32>
    %c59 = arith.constant 59 : index
    %263 = memref.load %arg1[%c59] : memref<63xf32, #tpu.memory_space<smem>>
    %264 = vector.broadcast %263 : f32 to vector<1x1x1x1xf32>
    %265 = tpu.concatenate %260, %262, %264 in 1 : vector<1x1x1x1xf32>, vector<1x1x1x1xf32>, vector<1x1x1x1xf32> -> vector<1x3x1x1xf32>
    %cst_18 = arith.constant 9.99999974E-6 : f32
    %266 = vector.broadcast %cst_18 : f32 to vector<1x3x1x1xf32>
    %267 = arith.addf %258, %266 : vector<1x3x1x1xf32>
    %268 = math.rsqrt %267 : vector<1x3x1x1xf32>
    %269 = arith.mulf %265, %268 : vector<1x3x1x1xf32>
    %c60 = arith.constant 60 : index
    %270 = memref.load %arg1[%c60] : memref<63xf32, #tpu.memory_space<smem>>
    %271 = vector.broadcast %270 : f32 to vector<1x1x1x1xf32>
    %c61 = arith.constant 61 : index
    %272 = memref.load %arg1[%c61] : memref<63xf32, #tpu.memory_space<smem>>
    %273 = vector.broadcast %272 : f32 to vector<1x1x1x1xf32>
    %c62 = arith.constant 62 : index
    %274 = memref.load %arg1[%c62] : memref<63xf32, #tpu.memory_space<smem>>
    %275 = vector.broadcast %274 : f32 to vector<1x1x1x1xf32>
    %276 = tpu.concatenate %271, %273, %275 in 1 : vector<1x1x1x1xf32>, vector<1x1x1x1xf32>, vector<1x1x1x1xf32> -> vector<1x3x1x1xf32>
    %277 = arith.mulf %253, %269 : vector<1x3x1x1xf32>
    %278 = arith.subf %276, %277 : vector<1x3x1x1xf32>
    %279 = vector.broadcast %269 : vector<1x3x1x1xf32> to vector<2x3x3x3xf32>
    %280 = arith.mulf %242, %279 : vector<2x3x3x3xf32>
    %281 = vector.broadcast %278 : vector<1x3x1x1xf32> to vector<2x3x3x3xf32>
    %282 = arith.addf %280, %281 : vector<2x3x3x3xf32>
    %c36 = arith.constant 36 : index
    %283 = memref.load %arg1[%c36] : memref<63xf32, #tpu.memory_space<smem>>
    %284 = vector.extract_strided_slice %242 {offsets = [0, 0, 0, 0], sizes = [2, 1, 3, 3], strides = [1, 1, 1, 1]} : vector<2x3x3x3xf32> to vector<2x1x3x3xf32>
    %285 = vector.broadcast %283 : f32 to vector<2x1x3x3xf32>
    %286 = arith.mulf %284, %285 : vector<2x1x3x3xf32>
    %c37 = arith.constant 37 : index
    %287 = memref.load %arg1[%c37] : memref<63xf32, #tpu.memory_space<smem>>
    %288 = vector.extract_strided_slice %242 {offsets = [0, 1, 0, 0], sizes = [2, 1, 3, 3], strides = [1, 1, 1, 1]} : vector<2x3x3x3xf32> to vector<2x1x3x3xf32>
    %289 = vector.broadcast %287 : f32 to vector<2x1x3x3xf32>
    %290 = arith.mulf %288, %289 : vector<2x1x3x3xf32>
    %291 = arith.addf %286, %290 : vector<2x1x3x3xf32>
    %c38 = arith.constant 38 : index
    %292 = memref.load %arg1[%c38] : memref<63xf32, #tpu.memory_space<smem>>
    %293 = vector.extract_strided_slice %242 {offsets = [0, 2, 0, 0], sizes = [2, 1, 3, 3], strides = [1, 1, 1, 1]} : vector<2x3x3x3xf32> to vector<2x1x3x3xf32>
    %294 = vector.broadcast %292 : f32 to vector<2x1x3x3xf32>
    %295 = arith.mulf %293, %294 : vector<2x1x3x3xf32>
    %296 = arith.addf %291, %295 : vector<2x1x3x3xf32>
    %c39 = arith.constant 39 : index
    %297 = memref.load %arg1[%c39] : memref<63xf32, #tpu.memory_space<smem>>
    %298 = vector.extract_strided_slice %242 {offsets = [0, 0, 0, 0], sizes = [2, 1, 3, 3], strides = [1, 1, 1, 1]} : vector<2x3x3x3xf32> to vector<2x1x3x3xf32>
    %299 = vector.broadcast %297 : f32 to vector<2x1x3x3xf32>
    %300 = arith.mulf %298, %299 : vector<2x1x3x3xf32>
    %c40 = arith.constant 40 : index
    %301 = memref.load %arg1[%c40] : memref<63xf32, #tpu.memory_space<smem>>
    %302 = vector.extract_strided_slice %242 {offsets = [0, 1, 0, 0], sizes = [2, 1, 3, 3], strides = [1, 1, 1, 1]} : vector<2x3x3x3xf32> to vector<2x1x3x3xf32>
    %303 = vector.broadcast %301 : f32 to vector<2x1x3x3xf32>
    %304 = arith.mulf %302, %303 : vector<2x1x3x3xf32>
    %305 = arith.addf %300, %304 : vector<2x1x3x3xf32>
    %c41 = arith.constant 41 : index
    %306 = memref.load %arg1[%c41] : memref<63xf32, #tpu.memory_space<smem>>
    %307 = vector.extract_strided_slice %242 {offsets = [0, 2, 0, 0], sizes = [2, 1, 3, 3], strides = [1, 1, 1, 1]} : vector<2x3x3x3xf32> to vector<2x1x3x3xf32>
    %308 = vector.broadcast %306 : f32 to vector<2x1x3x3xf32>
    %309 = arith.mulf %307, %308 : vector<2x1x3x3xf32>
    %310 = arith.addf %305, %309 : vector<2x1x3x3xf32>
    %c42 = arith.constant 42 : index
    %311 = memref.load %arg1[%c42] : memref<63xf32, #tpu.memory_space<smem>>
    %312 = vector.extract_strided_slice %242 {offsets = [0, 0, 0, 0], sizes = [2, 1, 3, 3], strides = [1, 1, 1, 1]} : vector<2x3x3x3xf32> to vector<2x1x3x3xf32>
    %313 = vector.broadcast %311 : f32 to vector<2x1x3x3xf32>
    %314 = arith.mulf %312, %313 : vector<2x1x3x3xf32>
    %c43 = arith.constant 43 : index
    %315 = memref.load %arg1[%c43] : memref<63xf32, #tpu.memory_space<smem>>
    %316 = vector.extract_strided_slice %242 {offsets = [0, 1, 0, 0], sizes = [2, 1, 3, 3], strides = [1, 1, 1, 1]} : vector<2x3x3x3xf32> to vector<2x1x3x3xf32>
    %317 = vector.broadcast %315 : f32 to vector<2x1x3x3xf32>
    %318 = arith.mulf %316, %317 : vector<2x1x3x3xf32>
    %319 = arith.addf %314, %318 : vector<2x1x3x3xf32>
    %c44 = arith.constant 44 : index
    %320 = memref.load %arg1[%c44] : memref<63xf32, #tpu.memory_space<smem>>
    %321 = vector.extract_strided_slice %242 {offsets = [0, 2, 0, 0], sizes = [2, 1, 3, 3], strides = [1, 1, 1, 1]} : vector<2x3x3x3xf32> to vector<2x1x3x3xf32>
    %322 = vector.broadcast %320 : f32 to vector<2x1x3x3xf32>
    %323 = arith.mulf %321, %322 : vector<2x1x3x3xf32>
    %324 = arith.addf %319, %323 : vector<2x1x3x3xf32>
    %325 = tpu.concatenate %296, %310, %324 in 1 : vector<2x1x3x3xf32>, vector<2x1x3x3xf32>, vector<2x1x3x3xf32> -> vector<2x3x3x3xf32>
    %326 = vector.extract_strided_slice %325 {offsets = [0, 0, 0, 0], sizes = [2, 3, 2, 2], strides = [1, 1, 1, 1]} : vector<2x3x3x3xf32> to vector<2x3x2x2xf32>
    %cst_19 = arith.constant 0.000000e+00 : f32
    %327 = vector.broadcast %cst_19 : f32 to vector<2x3x2x1xf32>
    %cst_20 = arith.constant 0.000000e+00 : f32
    %328 = vector.broadcast %cst_20 : f32 to vector<2x3x1x3xf32>
    %329 = tpu.concatenate %327, %326 in 3 : vector<2x3x2x1xf32>, vector<2x3x2x2xf32> -> vector<2x3x2x3xf32>
    %330 = tpu.concatenate %328, %329 in 2 : vector<2x3x1x3xf32>, vector<2x3x2x3xf32> -> vector<2x3x3x3xf32>
    %c54 = arith.constant 54 : index
    %331 = memref.load %arg1[%c54] : memref<63xf32, #tpu.memory_space<smem>>
    %332 = vector.broadcast %331 : f32 to vector<1x1x1x1xf32>
    %c55 = arith.constant 55 : index
    %333 = memref.load %arg1[%c55] : memref<63xf32, #tpu.memory_space<smem>>
    %334 = vector.broadcast %333 : f32 to vector<1x1x1x1xf32>
    %c56 = arith.constant 56 : index
    %335 = memref.load %arg1[%c56] : memref<63xf32, #tpu.memory_space<smem>>
    %336 = vector.broadcast %335 : f32 to vector<1x1x1x1xf32>
    %337 = tpu.concatenate %332, %334, %336 in 1 : vector<1x1x1x1xf32>, vector<1x1x1x1xf32>, vector<1x1x1x1xf32> -> vector<1x3x1x1xf32>
    %338 = vector.broadcast %337 : vector<1x3x1x1xf32> to vector<2x3x3x3xf32>
    %339 = arith.addf %330, %338 : vector<2x3x3x3xf32>
    %340 = vector.extract_strided_slice %14 {offsets = [0, 0, 0, 0], sizes = [2, 3, 3, 3], strides = [1, 1, 1, 1]} : vector<2x3x8x8xf32> to vector<2x3x3x3xf32>
    %341 = arith.mulf %339, %340 : vector<2x3x3x3xf32>
    %342 = arith.addf %341, %282 : vector<2x3x3x3xf32>
    %c0_21 = arith.constant 0 : index
    %c0_22 = arith.constant 0 : index
    %c0_23 = arith.constant 0 : index
    %c0_24 = arith.constant 0 : index
    %343 = vector.load %arg2[%c0_21, %c0_22, %c0_23, %c0_24] : memref<2x3x3x3xf32, #tpu.memory_space<vmem>>, vector<2x3x3x3xf32>
    tpu.vector_store %arg2[%c0_21, %c0_22, %c0_23, %c0_24], %342 {strides = array<i32>} : memref<2x3x3x3xf32, #tpu.memory_space<vmem>>, vector<2x3x3x3xf32>,
    return
  }
}

</mosaic_0001>

<bundles_post_ra>
// kernel: model_forward.1
= control target key start
LH: loop header
LB: loop body
LE: loop exit
PB: predicated region body
PF: predicated region fallthrough
CT: control target
= control target key end

     0   :  { %7 = vsyncpa [#allocation3], 0  ;;  %s2138_s0 = inlined_call_operand.vmem [shape: f32[2,3,8,8], index: 0, kind: input, shape index: {}]   ;;  %s2139_s1 = inlined_call_operand.vmem [shape: f32[63], index: 1, kind: input, shape index: {}]   ;;  %s2140_s2 = inlined_call_operand.vmem [shape: f32[2,3,3,3], index: 2, kind: output, shape index: {}]  }
   0x1   :  { %s16_s11 = sshll.u32 %s2139_s1, 4  ;;  %s17_s11 = int_to_ptr.vmem [resolvable:$true] %s16_s11 }
   0x2   :  { %s1436_s12 = scalar_lea.vmem %s17_s11, 16  ;;  %p1441_p1 = scmp.lt.s32.totalorder %s17_s11, %s17_s11 }
   0x3   :  { %p1437_p0 = scmp.ne.s32.totalorder %s17_s11, %s1436_s12  ;;  %p1442_p2 = scmp.lt.s32.totalorder %s1436_s12, %s1436_s12 }
   0x5   :  { %p1443_p3 = por %p1442_p2, %p1441_p1 }
   0x7   :  { %p1444_p4 = pnand %p1443_p3, %p1437_p0 }
   0x9   :  { %1447 = shalt.err (!%p1444_p4)
}
   0xa   :  { %s1450_s13 = smov [#allocation2]  }
   0xb   :  { %19 = dma.vmem_to_smem %s17_s11, 16, %s1450_s13, [#allocation3]  }
   0xc   :  { %1448 = dma.done.wait [#allocation3], 16  }
   0xd   :  { %1449 = vsyncadd [#allocation3], 4294967280 }
   0xe   :  { %23 = sfence }
   0xf   :  { %v1475_v0 = vld [vmem:[%s2138_s0] sm:$0xff]  ;;  %vm30_vm0 = vcmask 64512   ;;  %v1480_v1 = vld [vmem:[%s2138_s0 + $0x8] sm:$0xff]  ;;  %v1485_v2 = vld [vmem:[%s2138_s0 + $0x18] sm:$0xff]  ;;  %s1535_s25 = sld [smem:[#allocation2 + $0x1]]  ;;  %s1451_s30 = smov 127  }
  0x10   :  { %v31_v3 = vsel %vm30_vm0, %v1475_v0, -inf  ;;  %v34_v4 = vsel %vm30_vm0, %v1480_v1, -inf  ;;  %v1494_v5 = vld [vmem:[%s2138_s0 + $0x20] sm:$0xff]  ;;  %v40_v6 = vsel %vm30_vm0, %v1485_v2, -inf  ;;  %v1503_v8 = vld [vmem:[%s2138_s0 + $0x10] sm:$0xff]  ;;  %v1508_v9 = vld [vmem:[%s2138_s0 + $0x28] sm:$0xff] }
  0x11   :  { %32 = vmax.xlane.f32.xlu0 %v31_v3  ;;  %35 = vmax.xlane.f32.xlu1 %v34_v4  ;;  %v43_v7 = vsel %vm30_vm0, %v1494_v5, -inf  ;;  %v37_v10 = vsel %vm30_vm0, %v1503_v8, -inf  ;;  %v46_v11 = vsel %vm30_vm0, %v1508_v9, -inf  ;;  %s1537_s26 = sld [smem:[#allocation2 + $0x19]]  ;;  %v115_v53 = vadd.f32 1.0, %v1475_v0 }
  0x12   :  { %s1542_s27 = sld [smem:[#allocation2 + $0xd]]  ;;  %v118_v63 = vadd.f32 1.0, %v1485_v2  ;;  %vm583_vm1 = vcmask 55296   ;;  %vm620_vm2 = vcmask 1046528   ;;  %vm846_vm3 = vcmask 1040384  }
  0x13   :  { %s1545_s28 = sld [smem:[#allocation2 + $0x5]]  ;;  %vm853_vm4 = vcmask 1041408   ;;  %vm932_vm5 = vcmask 7168   ;;  %vm939_vm6 = vcmask 15360   ;;  %vm952_vm7 = vcmask 18432  }
  0x14   :  { %s1558_s29 = sld [smem:[#allocation2 + $0x11]]  ;;  %vm989_vm8 = vcmask 1042432  }
  0x15   :  { %41 = vmax.xlane.f32.xlu0 %v40_v6  ;;  %44 = vmax.xlane.f32.xlu1 %v43_v7  ;;  %v132_v61 = vstv %s1535_s25  ;;  %v116_v7 = vadd.f32 1.0, %v1480_v1  ;;  %s1571_s3 = sld [smem:[#allocation2 + $0x1d]] }
  0x16   :  { %s1578_s4 = sld [smem:[#allocation2 + $0x9]] }
  0x17   :  { %s1593_s5 = sld [smem:[#allocation2 + $0x15]] }
  0x18   :  { %s1605_s6 = sld [smem:[#allocation2 + $0x3]] }
  0x19   :  { %38 = vmax.xlane.f32.xlu0 %v37_v10  ;;  %47 = vmax.xlane.f32.xlu1 %v46_v11  ;;  %s1608_s7 = sld [smem:[#allocation2 + $0x21]] }
  0x1a   :  { %s1615_s8 = sld [smem:[#allocation2 + $0xf]] }
  0x1b   :  { %s1627_s9 = sld [smem:[#allocation2 + $0x1b]] }
  0x1c   :  { %s1638_s10 = sld [smem:[#allocation2 + $0x7]] }
  0x1d   :  { %s1645_s11 = sld [smem:[#allocation2 + $0x13]] }
  0x1e   :  { %s1652_s12 = sld [smem:[#allocation2 + $0x1f]] }
  0x1f   :  { %s1660_s13 = sld [smem:[#allocation2 + $0xb]] }
  0x20   :  { %s1667_s14 = sld [smem:[#allocation2 + $0x17]] }
  0x21   :  { %s1674_s15 = sld [smem:[#allocation2 + $0x23]] }
  0x22   :  { %s1708_s1 = sld [smem:[#allocation2]] }
  0x23   :  { %s1710_s16 = sld [smem:[#allocation2 + $0x2]] }
  0x24   :  { %s1712_s17 = sld [smem:[#allocation2 + $0x18]] }
  0x25   :  { %s1718_s18 = sld [smem:[#allocation2 + $0xc]] }
  0x26   :  { %s1720_s19 = sld [smem:[#allocation2 + $0xe]] }
  0x27   :  { %s1722_s20 = sld [smem:[#allocation2 + $0x4]] }
  0x28   :  { %s1728_s21 = sld [smem:[#allocation2 + $0x10]] }
  0x29   :  { %s1730_s22 = sld [smem:[#allocation2 + $0x1a]] }
  0x2a   :  { %s1734_s23 = sld [smem:[#allocation2 + $0x6]] }
  0x2b   :  { %s1736_s24 = sld [smem:[#allocation2 + $0x1c]] }
  0x2c   :  { %s1742_s25 = sld [smem:[#allocation2 + $0x8]] }
  0x9a   :  { %v33_v12 = vpop.xlane.xlu0 %32  ;;  %v36_v13 = vpop.xlane.xlu1 %35 }
  0x9b   :  { %v49_v14 = vsub.f32 %v1475_v0, %v33_v12  ;;  %v50_v15 = vsub.f32 %v1480_v1, %v36_v13 }
  0x9d   :  { %v55_v16 = vmul.f32 1.442695, %v49_v14  ;;  %v57_v17 = vmul.f32 1.442695, %v50_v15  ;;  %v416_v14 = vstv %s1537_s26  ;;  %s1746_s26 = sld [smem:[#allocation2 + $0x12]] }
  0x9e   :  { %v42_v18 = vpop.xlane.xlu0 %41  ;;  %v45_v19 = vpop.xlane.xlu1 %44 }
  0x9f   :  { %1394 = vpow2.f32 %v55_v16  ;;  %v52_v20 = vsub.f32 %v1485_v2, %v42_v18  ;;  %v53_v21 = vsub.f32 %v1494_v5, %v45_v19  ;;  %v274_v19 = vstv %s1542_s27  ;;  %s1750_s27 = sld [smem:[#allocation2 + $0x14]] }
  0xa0   :  { %1396 = vpow2.f32 %v57_v17 }
  0xa1   :  { %v61_v22 = vmul.f32 1.442695, %v52_v20  ;;  %v63_v23 = vmul.f32 1.442695, %v53_v21  ;;  %v180_v20 = vstv %s1545_s28  ;;  %s1752_s28 = sld [smem:[#allocation2 + $0x1e]] }
  0xa2   :  { %v39_v24 = vpop.xlane.xlu0 %38  ;;  %v48_v25 = vpop.xlane.xlu1 %47 }
  0xa3   :  { %1398 = vpow2.f32 %v61_v22  ;;  %v51_v26 = vsub.f32 %v1503_v8, %v39_v24  ;;  %v54_v27 = vsub.f32 %v1508_v9, %v48_v25 }
  0xa4   :  { %1400 = vpow2.f32 %v63_v23 }
  0xa5   :  { %v59_v28 = vmul.f32 1.442695, %v51_v26  ;;  %v65_v29 = vmul.f32 1.442695, %v54_v27  ;;  %v322_v26 = vstv %s1558_s29  ;;  %v119_v27 = vadd.f32 1.0, %v1494_v5  ;;  %s1759_s29 = sld [smem:[#allocation2 + $0x20]] }
  0xa7   :  { %1402 = vpow2.f32 %v59_v28  ;;  %v117_v28 = vadd.f32 1.0, %v1503_v8 }
  0xa8   :  { %1404 = vpow2.f32 %v65_v29 }
  0xac   :  { %v1395_v30 = vpop.eup %1394 }
  0xad   :  { %v1397_v31 = vpop.eup %1396  ;;  %v67_v32 = vsel %vm30_vm0, %v1395_v30, 0.0 }
  0xae   :  { %68 = vadd.xlane.f32.xlu0 %v67_v32  ;;  %v70_v33 = vsel %vm30_vm0, %v1397_v31, 0.0 }
  0xb0   :  { %v1399_v34 = vpop.eup %1398 }
  0xb1   :  { %v1522_v35 = vpop.eup %1400  ;;  %v76_v36 = vsel %vm30_vm0, %v1399_v34, 0.0 }
  0xb2   :  { %71 = vadd.xlane.f32.xlu0 %v70_v33  ;;  %77 = vadd.xlane.f32.xlu1 %v76_v36  ;;  %v79_v37 = vsel %vm30_vm0, %v1522_v35, 0.0 }
  0xb4   :  { %v1527_v38 = vpop.eup %1402 }
  0xb5   :  { %v1529_v39 = vpop.eup %1404  ;;  %v73_v40 = vsel %vm30_vm0, %v1527_v38, 0.0 }
  0xb6   :  { %80 = vadd.xlane.f32.xlu1 %v79_v37  ;;  %74 = vadd.xlane.f32.xlu0 %v73_v40  ;;  %v82_v41 = vsel %vm30_vm0, %v1529_v39, 0.0 }
  0xba   :  { %83 = vadd.xlane.f32.xlu1 %v82_v41 }
 0x137   :  { %v69_v42 = vpop.xlane.xlu0 %68 }
 0x138   :  { %1406 = vrcp.f32 %v69_v42 }
 0x13b   :  { %v78_v43 = vpop.xlane.xlu1 %77  ;;  %v72_v44 = vpop.xlane.xlu0 %71 }
 0x13c   :  { %1408 = vrcp.f32 %v78_v43 }
 0x13d   :  { %1410 = vrcp.f32 %v72_v44 }
 0x13f   :  { %v81_v45 = vpop.xlane.xlu1 %80  ;;  %v75_v46 = vpop.xlane.xlu0 %74 }
 0x140   :  { %1412 = vrcp.f32 %v81_v45 }
 0x141   :  { %1414 = vrcp.f32 %v75_v46 }
 0x143   :  { %v84_v50 = vpop.xlane.xlu1 %83 }
 0x144   :  { %1416 = vrcp.f32 %v84_v50 }
 0x145   :  { %v1407_v47 = vpop.eup %1406 }
 0x146   :  { %v91_v48 = vmul.f32 %v1407_v47, %v69_v42 }
 0x148   :  { %v97_v49 = vsub.f32 2.0, %v91_v48  ;;  %v512_v48 = vstv %s1608_s7  ;;  %s1842_s7 = sld [smem:[#allocation2 + $0x2e]] }
 0x149   :  { %v1409_v51 = vpop.eup %1408 }
 0x14a   :  { %v1411_v52 = vpop.eup %1410  ;;  %v103_v54 = vmul.f32 %v1407_v47, %v97_v49  ;;  %v94_v55 = vmul.f32 %v1409_v51, %v78_v43  ;;  %v370_v43 = vstv %s1593_s5  ;;  %v158_v49 = vstv %s1605_s6  ;;  %s1780_s5 = sld [smem:[#allocation2 + $0x22]] }
 0x14b   :  { %v92_v56 = vmul.f32 %v1411_v52, %v72_v44  ;;  %v120_v44 = vadd.f32 1.0, %v1508_v9  ;;  %s1826_s6 = sld [smem:[#allocation2 + $0x2d]] }
 0x14c   :  { %v1540_v57 = vmul.f32 %v1395_v30, %v103_v54  ;;  %v100_v58 = vsub.f32 2.0, %v94_v55 }
 0x14d   :  { %v1413_v59 = vpop.eup %1412  ;;  %v98_v60 = vsub.f32 2.0, %v92_v56  ;;  %v442_v56 = vstv %s1627_s9  ;;  %s1342_s9 = sld [smem:[#allocation2 + $0x30]] }
 0x14e   :  { %v1415_v62 = vpop.eup %1414  ;;  %v1549_v0 = vmul.f32 %v115_v53, %v1540_v57  ;;  %v106_v3 = vmul.f32 %v1409_v51, %v100_v58  ;;  %v95_v6 = vmul.f32 %v1413_v59, %v81_v45 }
 0x14f   :  { %v104_v4 = vmul.f32 %v1411_v52, %v98_v60  ;;  %v93_v11 = vmul.f32 %v1415_v62, %v75_v46  ;;  %v300_v52 = vstv %s1615_s8  ;;  %s1856_s8 = sld [smem:[#allocation2 + $0x2f]] }
 0x150   :  { %v1552_v10 = vmul.f32 %v1399_v34, %v106_v3  ;;  %v133_v12 = vmul.f32 %v132_v61, %v1549_v0  ;;  %v101_v15 = vsub.f32 2.0, %v95_v6  ;;  %v417_v18 = vmul.f32 %v416_v14, %v1549_v0 }
 0x151   :  { %v1555_v13 = vmul.f32 %v1397_v31, %v104_v4  ;;  %v99_v16 = vsub.f32 2.0, %v93_v11  ;;  %v1417_v21 = vpop.eup %1416  ;;  %v275_v24 = vmul.f32 %v274_v19, %v1549_v0  ;;  %v464_v34 = vstv %s1571_s3  ;;  %s1764_s3 = sld [smem:[#allocation2 + $0xa]] }
 0x152   :  { %v1561_v2 = vmul.f32 %v118_v63, %v1552_v10  ;;  %137 = vrot.lane.b32.xlu0 %v133_v12, %s1451_s30  ;;  %v107_v22 = vmul.f32 %v1413_v59, %v101_v15  ;;  %v96_v29 = vmul.f32 %v1417_v21, %v84_v50  ;;  %v159_v51 = vmul.f32 %v158_v49, %v1549_v0 }
 0x153   :  { %v1565_v1 = vmul.f32 %v116_v7, %v1555_v13  ;;  %v105_v23 = vmul.f32 %v1415_v62, %v99_v16  ;;  %v301_v55 = vmul.f32 %v300_v52, %v1549_v0  ;;  %v443_v60 = vmul.f32 %v442_v56, %v1549_v0 }
 0x154   :  { %v134_v17 = vmul.f32 %v132_v61, %v1561_v2  ;;  %v1585_v30 = vmul.f32 %v1522_v35, %v107_v22  ;;  %v276_v32 = vmul.f32 %v274_v19, %v1561_v2  ;;  %v102_v5 = vsub.f32 2.0, %v96_v29 }
 0x155   :  { %v181_v25 = vmul.f32 %v180_v20, %v1565_v1  ;;  %v1588_v31 = vmul.f32 %v1527_v38, %v105_v23  ;;  %v323_v33 = vmul.f32 %v322_v26, %v1565_v1  ;;  %v418_v36 = vmul.f32 %v416_v14, %v1561_v2 }
 0x156   :  { %139 = vrot.lane.b32.xlu1 %v134_v17, %s1451_s30  ;;  %421 = vrot.lane.b32.xlu0 %v417_v18, %s1451_s30  ;;  %v1598_v8 = vmul.f32 %v119_v27, %v1585_v30  ;;  %v465_v37 = vmul.f32 %v464_v34, %v1565_v1  ;;  %v228_v38 = vstv %s1578_s4  ;;  %v108_v40 = vmul.f32 %v1417_v21, %v102_v5  ;;  %s1768_s4 = sld [smem:[#allocation2 + $0x16]] }
 0x157   :  { %v1601_v35 = vmul.f32 %v117_v28, %v1588_v31  ;;  %v163_v54 = vrot.slane %v159_v51, 1  ;;  %v305_v59 = vrot.slane %v301_v55, 1  ;;  %v206_v61 = vstv %s1638_s10  ;;  %s1343_s10 = sld [smem:[#allocation2 + $0x31]] }
 0x158   :  { %v182_v41 = vmul.f32 %v180_v20, %v1598_v8  ;;  %v1621_v45 = vmul.f32 %v1529_v39, %v108_v40  ;;  %v324_v46 = vmul.f32 %v322_v26, %v1598_v8  ;;  %v466_v9 = vmul.f32 %v464_v34, %v1598_v8 }
 0x159   :  { %v229_v42 = vmul.f32 %v228_v38, %v1601_v35  ;;  %v371_v47 = vmul.f32 %v370_v43, %v1601_v35  ;;  %v513_v39 = vmul.f32 %v512_v48, %v1601_v35  ;;  %v447_v63 = vrot.slane %v443_v60, 1 }
 0x15a   :  { %279 = vrot.lane.b32.xlu1 %v275_v24, %s1451_s30  ;;  %185 = vrot.lane.b32.xlu0 %v181_v25, %s1451_s30  ;;  %v1632_v50 = vmul.f32 %v120_v44, %v1621_v45  ;;  %v160_v3 = vmul.f32 %v158_v49, %v1561_v2  ;;  %v207_v4 = vmul.f32 %v206_v61, %v1565_v1  ;;  %v348_v6 = vstv %s1645_s11  ;;  %s1344_s11 = sld [smem:[#allocation2 + $0x32]] }
 0x15b   :  { %v302_v12 = vmul.f32 %v300_v52, %v1561_v2  ;;  %v349_v14 = vmul.f32 %v348_v6, %v1565_v1  ;;  %v490_v15 = vstv %s1652_s12  ;;  %v444_v18 = vmul.f32 %v442_v56, %v1561_v2  ;;  %s1345_s12 = sld [smem:[#allocation2 + $0x33]] }
 0x15c   :  { %v230_v53 = vmul.f32 %v228_v38, %v1632_v50  ;;  %v372_v58 = vmul.f32 %v370_v43, %v1632_v50  ;;  %v514_v62 = vmul.f32 %v512_v48, %v1632_v50  ;;  %v164_v7 = vrot.slane %v160_v3, 1 }
 0x15d   :  { %v211_v11 = vrot.slane %v207_v4, 1  ;;  %v306_v16 = vrot.slane %v302_v12, 1  ;;  %v353_v17 = vrot.slane %v349_v14, 1  ;;  %v491_v19 = vmul.f32 %v490_v15, %v1565_v1 }
 0x15e   :  { %281 = vrot.lane.b32.xlu1 %v276_v32, %s1451_s30  ;;  %327 = vrot.lane.b32.xlu0 %v323_v33, %s1451_s30  ;;  %v254_v20 = vstv %s1660_s13  ;;  %v448_v21 = vrot.slane %v444_v18, 1  ;;  %v208_v23 = vmul.f32 %v206_v61, %v1598_v8  ;;  %v396_v25 = vstv %s1667_s14  ;;  %s1346_s13 = sld [smem:[#allocation2 + $0x34]] }
 0x15f   :  { %v495_v22 = vrot.slane %v491_v19, 1  ;;  %v255_v24 = vmul.f32 %v254_v20, %v1601_v35  ;;  %v350_v28 = vmul.f32 %v348_v6, %v1598_v8  ;;  %v397_v29 = vmul.f32 %v396_v25, %v1601_v35  ;;  %s1347_s14 = sld [smem:[#allocation2 + $0x35]] }
 0x160   :  { %v212_v26 = vrot.slane %v208_v23, 1  ;;  %v538_v32 = vstv %s1674_s15  ;;  %v492_v5 = vmul.f32 %v490_v15, %v1598_v8  ;;  %v256_v40 = vmul.f32 %v254_v20, %v1632_v50 }
 0x161   :  { %v259_v27 = vrot.slane %v255_v24, 1  ;;  %v354_v33 = vrot.slane %v350_v28, 1  ;;  %v401_v34 = vrot.slane %v397_v29, 1  ;;  %v540_v44 = vmul.f32 %v538_v32, %v1632_v50 }
 0x162   :  { %423 = vrot.lane.b32.xlu1 %v418_v36, %s1451_s30  ;;  %469 = vrot.lane.b32.xlu0 %v465_v37, %s1451_s30  ;;  %v539_v36 = vmul.f32 %v538_v32, %v1601_v35  ;;  %v496_v37 = vrot.slane %v492_v5, 1  ;;  %v270_v3 = vstv %s1718_s18  ;;  %v288_v4 = vstv %s1720_s19 }
 0x163   :  { %v271_v14 = vmul.f32 %v270_v3, %v1549_v0  ;;  %v174_v18 = vstv %s1722_s20  ;;  %v194_v19 = vstv %s1734_s23  ;;  %v336_v5 = vstv %s1746_s26  ;;  %s1364_s20 = sld [smem:[#allocation2 + $0x37]] }
 0x164   :  { %v543_v38 = vrot.slane %v539_v36, 1  ;;  %v195_v32 = vmul.f32 %v194_v19, %v1565_v1 }
 0x166   :  { %187 = vrot.lane.b32.xlu1 %v182_v41, %s1451_s30  ;;  %233 = vrot.lane.b32.xlu0 %v229_v42, %s1451_s30  ;;  %v260_v41 = vrot.slane %v256_v40, 1  ;;  %v398_v42 = vmul.f32 %v396_v25, %v1632_v50  ;;  %v316_v25 = vstv %s1728_s21  ;;  %s2089_s21 = sld [smem:[#allocation2 + $0x38]] }
 0x168   :  { %v402_v43 = vrot.slane %v398_v42, 1  ;;  %v317_v42 = vmul.f32 %v316_v25, %v1565_v1 }
 0x16a   :  { %329 = vrot.lane.b32.xlu1 %v324_v46, %s1451_s30  ;;  %375 = vrot.lane.b32.xlu0 %v371_v47, %s1451_s30  ;;  %v544_v46 = vrot.slane %v540_v44, 1 }
 0x16e   :  { %471 = vrot.lane.b32.xlu1 %v466_v9, %s1451_s30  ;;  %517 = vrot.lane.b32.xlu0 %v513_v39, %s1451_s30 }
 0x172   :  { %235 = vrot.lane.b32.xlu1 %v230_v53, %s1451_s30  ;;  %165 = vrot.lane.b32.xlu0 %v163_v54, %s1451_s30 }
 0x176   :  { %377 = vrot.lane.b32.xlu1 %v372_v58, %s1451_s30  ;;  %307 = vrot.lane.b32.xlu0 %v305_v59, %s1451_s30  ;;  %v128_v58 = vstv %s1708_s1  ;;  %v146_v59 = vstv %s1710_s16 }
 0x177   :  { %v130_v40 = vmul.f32 %v128_v58, %v1561_v2 }
 0x17a   :  { %519 = vrot.lane.b32.xlu1 %v514_v62, %s1451_s30  ;;  %449 = vrot.lane.b32.xlu0 %v447_v63, %s1451_s30  ;;  %v129_v62 = vmul.f32 %v128_v58, %v1549_v0  ;;  %v147_v63 = vmul.f32 %v146_v59, %v1549_v0  ;;  %v242_v58 = vstv %s1764_s3 }
 0x17c   :  { %v151_v15 = vrot.slane %v147_v63, 1  ;;  %v478_v63 = vstv %s1752_s28 }
 0x17e   :  { %167 = vrot.lane.b32.xlu1 %v164_v7, %s1451_s30  ;;  %213 = vrot.lane.b32.xlu0 %v211_v11, %s1451_s30  ;;  %v412_v7 = vstv %s1712_s17 }
 0x182   :  { %309 = vrot.lane.b32.xlu1 %v306_v16, %s1451_s30  ;;  %355 = vrot.lane.b32.xlu0 %v353_v17, %s1451_s30  ;;  %v289_v16 = vmul.f32 %v288_v4, %v1549_v0  ;;  %v430_v17 = vstv %s1730_s22 }
 0x184   :  { %v293_v29 = vrot.slane %v289_v16, 1 }
 0x186   :  { %451 = vrot.lane.b32.xlu1 %v448_v21, %s1451_s30  ;;  %497 = vrot.lane.b32.xlu0 %v495_v22, %s1451_s30  ;;  %v413_v22 = vmul.f32 %v412_v7, %v1549_v0 }
 0x18a   :  { %215 = vrot.lane.b32.xlu1 %v212_v26, %s1451_s30  ;;  %261 = vrot.lane.b32.xlu0 %v259_v27, %s1451_s30  ;;  %v431_v26 = vmul.f32 %v430_v17, %v1549_v0  ;;  %v175_v27 = vmul.f32 %v174_v18, %v1565_v1  ;;  %v364_v0 = vstv %s1750_s27 }
 0x18c   :  { %v435_v44 = vrot.slane %v431_v26, 1 }
 0x18e   :  { %357 = vrot.lane.b32.xlu1 %v354_v33, %s1451_s30  ;;  %403 = vrot.lane.b32.xlu0 %v401_v34, %s1451_s30  ;;  %v458_v33 = vstv %s1736_s24  ;;  %v222_v34 = vstv %s1742_s25 }
 0x192   :  { %499 = vrot.lane.b32.xlu1 %v496_v37, %s1451_s30  ;;  %545 = vrot.lane.b32.xlu0 %v543_v38, %s1451_s30 }
 0x196   :  { %263 = vrot.lane.b32.xlu1 %v260_v41, %s1451_s30 }
 0x19a   :  { %405 = vrot.lane.b32.xlu1 %v402_v43, %s1451_s30 }
 0x19e   :  { %547 = vrot.lane.b32.xlu1 %v544_v46, %s1451_s30  ;;  %v148_v46 = vmul.f32 %v146_v59, %v1561_v2  ;;  %v272_v59 = vmul.f32 %v270_v3, %v1561_v2  ;;  %v414_v3 = vmul.f32 %v412_v7, %v1561_v2  ;;  %v243_v7 = vmul.f32 %v242_v58, %v1601_v35 }
 0x1a0   :  { %v152_v26 = vrot.slane %v148_v46, 1 }
 0x1c4   :  { %v138_v47 = vpop.permute.xlu0 %137 }
 0x1c5   :  { %v143_v6 = vadd.f32 %v138_v47, %v129_v62  ;;  %v337_v62 = vmul.f32 %v336_v5, %v1565_v1 }
 0x1c7   :  { %v155_v21 = vadd.f32 %v151_v15, %v143_v6  ;;  %v506_v6 = vstv %s1759_s29 }
 0x1c8   :  { %v1700_v48 = vpop.permute.xlu1 %139  ;;  %v422_v49 = vpop.permute.xlu0 %421 }
 0x1c9   :  { %v427_v36 = vadd.f32 %v422_v49, %v413_v22  ;;  %v199_v49 = vrot.slane %v195_v32, 1  ;;  %v144_v15 = vadd.f32 %v1700_v48, %v130_v40  ;;  %v341_v48 = vrot.slane %v337_v62, 1 }
 0x1ca   :  { %v479_v32 = vmul.f32 %v478_v63, %v1565_v1  ;;  %v365_v62 = vmul.f32 %v364_v0, %v1601_v35 }
 0x1cc   :  { %v280_v9 = vpop.permute.xlu1 %279  ;;  %v1702_v39 = vpop.permute.xlu0 %185 }
 0x1cd   :  { %v285_v20 = vadd.f32 %v280_v9, %v271_v14  ;;  %v384_v14 = vstv %s1768_s4 }
 0x1cf   :  { %v297_v38 = vadd.f32 %v293_v29, %v285_v20  ;;  %v439_v20 = vadd.f32 %v435_v44, %v427_v36  ;;  %v176_v36 = vmul.f32 %v174_v18, %v1598_v8 }
 0x1d0   :  { %v1704_v51 = vpop.permute.xlu1 %281  ;;  %v1706_v52 = vpop.permute.xlu0 %327 }
 0x1d1   :  { %v286_v40 = vadd.f32 %v1704_v51, %v272_v59 }
 0x1d4   :  { %v1714_v53 = vpop.permute.xlu1 %423  ;;  %v1716_v54 = vpop.permute.xlu0 %469 }
 0x1d8   :  { %v1724_v55 = vpop.permute.xlu1 %187  ;;  %v1726_v56 = vpop.permute.xlu0 %233 }
 0x1dc   :  { %v1738_v60 = vpop.permute.xlu1 %329  ;;  %v1740_v61 = vpop.permute.xlu0 %375 }
 0x1e0   :  { %v1755_v11 = vpop.permute.xlu1 %471  ;;  %v1757_v12 = vpop.permute.xlu0 %517 }
 0x1e4   :  { %v1771_v23 = vpop.permute.xlu1 %235  ;;  %v166_v24 = vpop.permute.xlu0 %165 }
 0x1e5   :  { %v171_v28 = vadd.f32 %v166_v24, %v155_v21 }
 0x1e7   :  { %v177_v37 = vadd.f32 %v175_v27, %v171_v28  ;;  %v290_v27 = vmul.f32 %v288_v4, %v1561_v2  ;;  %v156_v4 = vadd.f32 %v152_v26, %v144_v15 }
 0x1e8   :  { %v1784_v41 = vpop.permute.xlu1 %377  ;;  %v308_v43 = vpop.permute.xlu0 %307 }
 0x1e9   :  { %v313_v47 = vadd.f32 %v308_v43, %v297_v38  ;;  %v191_v9 = vadd.f32 %v1702_v39, %v177_v37  ;;  %v459_v39 = vmul.f32 %v458_v33, %v1565_v1  ;;  %v432_v37 = vmul.f32 %v430_v17, %v1561_v2 }
 0x1ea   :  { %v526_v38 = vstv %s1780_s5  ;;  %v196_v1 = vmul.f32 %v194_v19, %v1598_v8  ;;  %v483_v17 = vrot.slane %v479_v32, 1  ;;  %v460_v32 = vmul.f32 %v458_v33, %v1598_v8  ;;  %s2036_s5 = sld [smem:[#allocation2 + $0x27]] }
 0x1eb   :  { %v319_v16 = vadd.f32 %v317_v42, %v313_v47  ;;  %v203_v21 = vadd.f32 %v199_v49, %v191_v9  ;;  %v294_v47 = vrot.slane %v290_v27, 1  ;;  %v428_v9 = vadd.f32 %v1714_v53, %v414_v3 }
 0x1ec   :  { %v1798_v22 = vpop.permute.xlu1 %519  ;;  %v450_v24 = vpop.permute.xlu0 %449  ;;  %v318_v49 = vmul.f32 %v316_v25, %v1598_v8  ;;  %v436_v15 = vrot.slane %v432_v37, 1  ;;  %v338_v53 = vmul.f32 %v336_v5, %v1598_v8  ;;  %v385_v25 = vmul.f32 %v384_v14, %v1601_v35 }
 0x1ed   :  { %v455_v28 = vadd.f32 %v450_v24, %v439_v20  ;;  %v333_v29 = vadd.f32 %v1706_v52, %v319_v16  ;;  %v223_v52 = vmul.f32 %v222_v34, %v1601_v35  ;;  %v298_v20 = vadd.f32 %v294_v47, %v286_v40 }
 0x1ee   :  { %v200_v24 = vrot.slane %v196_v1, 1  ;;  %v507_v3 = vmul.f32 %v506_v6, %v1601_v35  ;;  %v224_v1 = vmul.f32 %v222_v34, %v1632_v50 }
 0x1ef   :  { %v461_v42 = vadd.f32 %v459_v39, %v455_v28  ;;  %v345_v43 = vadd.f32 %v341_v48, %v333_v29  ;;  %v440_v48 = vadd.f32 %v436_v15, %v428_v9 }
 0x1f0   :  { %v168_v44 = vpop.permute.xlu1 %167  ;;  %v214_v46 = vpop.permute.xlu0 %213 }
 0x1f1   :  { %v172_v18 = vadd.f32 %v168_v44, %v156_v4  ;;  %v219_v2 = vadd.f32 %v214_v46, %v203_v21  ;;  %v475_v51 = vadd.f32 %v1716_v54, %v461_v42  ;;  %v247_v54 = vrot.slane %v243_v7, 1 }
 0x1f2   :  { %v389_v44 = vrot.slane %v385_v25, 1 }
 0x1f3   :  { %v178_v16 = vadd.f32 %v176_v36, %v172_v18  ;;  %v225_v19 = vadd.f32 %v223_v52, %v219_v2  ;;  %v487_v59 = vadd.f32 %v483_v17, %v475_v51 }
 0x1f4   :  { %v310_v21 = vpop.permute.xlu1 %309  ;;  %v356_v39 = vpop.permute.xlu0 %355 }
 0x1f5   :  { %v314_v26 = vadd.f32 %v310_v21, %v298_v20  ;;  %v361_v27 = vadd.f32 %v356_v39, %v345_v43  ;;  %v192_v28 = vadd.f32 %v1724_v55, %v178_v16  ;;  %v239_v29 = vadd.f32 %v1726_v56, %v225_v19 }
 0x1f6   :  { %v342_v43 = vrot.slane %v338_v53, 1  ;;  %v480_v55 = vmul.f32 %v478_v63, %v1598_v8  ;;  %v527_v56 = vmul.f32 %v526_v38, %v1601_v35  ;;  %v561_v8 = vstv %s1826_s6  ;;  %s2040_s6 = sld [smem:[#allocation2 + $0x2a]] }
 0x1f7   :  { %v320_v5 = vadd.f32 %v318_v49, %v314_v26  ;;  %v367_v36 = vadd.f32 %v365_v62, %v361_v27  ;;  %v204_v37 = vadd.f32 %v200_v24, %v192_v28  ;;  %v251_v40 = vadd.f32 %v247_v54, %v239_v29 }
 0x1f8   :  { %v452_v42 = vpop.permute.xlu1 %451  ;;  %v498_v4 = vpop.permute.xlu0 %497  ;;  %v484_v35 = vrot.slane %v480_v55, 1  ;;  %v531_v9 = vrot.slane %v527_v56, 1  ;;  %v565_v39 = vstv %s1842_s7  ;;  %v508_v28 = vmul.f32 %v506_v6, %v1632_v50  ;;  %s2042_s7 = sld [smem:[#allocation2 + $0x2b]] }
 0x1f9   :  { %v456_v33 = vadd.f32 %v452_v42, %v440_v48  ;;  %v503_v52 = vadd.f32 %v498_v4, %v487_v59  ;;  %v334_v46 = vadd.f32 %v1738_v60, %v320_v5  ;;  %v381_v47 = vadd.f32 %v1740_v61, %v367_v36 }
 0x1fa   :  { %v244_v60 = vmul.f32 %v242_v58, %v1632_v50  ;;  %v366_v59 = vmul.f32 %v364_v0, %v1632_v50  ;;  %v569_v48 = vstv %s1856_s8  ;;  %s1355_s8 = sld [smem:[#allocation2 + $0x25]] }
 0x1fb   :  { %v462_v7 = vadd.f32 %v460_v32, %v456_v33  ;;  %v509_v18 = vadd.f32 %v507_v3, %v503_v52  ;;  %v346_v2 = vadd.f32 %v342_v43, %v334_v46  ;;  %v393_v51 = vadd.f32 %v389_v44, %v381_v47 }
 0x1fc   :  { %v216_v17 = vpop.permute.xlu1 %215  ;;  %v262_v63 = vpop.permute.xlu0 %261  ;;  %v248_v24 = vrot.slane %v244_v60, 1 }
 0x1fd   :  { %v220_v61 = vadd.f32 %v216_v17, %v204_v37  ;;  %v267_v49 = vadd.f32 %v262_v63, %v251_v40  ;;  %v476_v34 = vadd.f32 %v1755_v11, %v462_v7  ;;  %v523_v62 = vadd.f32 %v1757_v12, %v509_v18 }
 0x1fe   :  { %v386_v11 = vmul.f32 %v384_v14, %v1632_v50  ;;  %v528_v14 = vmul.f32 %v526_v38, %v1632_v50 }
 0x1ff   :  { %v226_v15 = vadd.f32 %v224_v1, %v220_v61  ;;  %v1863_v16 = vadd.f32 %v561_v8, %v267_v49  ;;  %v488_v19 = vadd.f32 %v484_v35, %v476_v34  ;;  %v535_v20 = vadd.f32 %v531_v9, %v523_v62 }
 0x200   :  { %v358_v21 = vpop.permute.xlu1 %357  ;;  %v404_v58 = vpop.permute.xlu0 %403  ;;  %v390_v3 = vrot.slane %v386_v11, 1  ;;  %v532_v50 = vrot.slane %v528_v14, 1 }
 0x201   :  { %v362_v12 = vadd.f32 %v358_v21, %v346_v2  ;;  %v409_v54 = vadd.f32 %v404_v58, %v393_v51  ;;  %v584_v53 = vsel %vm583_vm1, %v1863_v16, 0.0  ;;  %v240_v25 = vadd.f32 %v1771_v23, %v226_v15 }
 0x202   :  { %585 = vadd.xlane.f32.xlu0 %v584_v53 }
 0x203   :  { %v368_v26 = vadd.f32 %v366_v59, %v362_v12  ;;  %v1875_v27 = vadd.f32 %v565_v39, %v409_v54  ;;  %v252_v0 = vadd.f32 %v248_v24, %v240_v25 }
 0x204   :  { %v500_v29 = vpop.permute.xlu1 %499  ;;  %v546_v32 = vpop.permute.xlu0 %545 }
 0x205   :  { %v504_v5 = vadd.f32 %v500_v29, %v488_v19  ;;  %v551_v36 = vadd.f32 %v546_v32, %v535_v20  ;;  %v587_v23 = vsel %vm583_vm1, %v1875_v27, 0.0  ;;  %v382_v37 = vadd.f32 %v1784_v41, %v368_v26 }
 0x206   :  { %588 = vadd.xlane.f32.xlu1 %v587_v23  ;;  %v578_v17 = vmul.f32 %v1875_v27, %v1875_v27 }
 0x207   :  { %v510_v40 = vadd.f32 %v508_v28, %v504_v5  ;;  %v1887_v42 = vadd.f32 %v569_v48, %v551_v36  ;;  %v394_v4 = vadd.f32 %v390_v3, %v382_v37 }
 0x208   :  { %v264_v6 = vpop.permute.xlu1 %263  ;;  %v596_v63 = vsel %vm583_vm1, %v578_v17, 0.0 }
 0x209   :  { %v268_v43 = vadd.f32 %v264_v6, %v252_v0  ;;  %v590_v44 = vsel %vm583_vm1, %v1887_v42, 0.0  ;;  %v524_v55 = vadd.f32 %v1798_v22, %v510_v40  ;;  %v577_v22 = vmul.f32 %v1863_v16, %v1863_v16 }
 0x20a   :  { %591 = vadd.xlane.f32.xlu0 %v590_v44 }
 0x20b   :  { %v1892_v38 = vadd.f32 %v561_v8, %v268_v43  ;;  %v536_v56 = vadd.f32 %v532_v50, %v524_v55  ;;  %v593_v51 = vsel %vm583_vm1, %v577_v22, 0.0  ;;  %v579_v8 = vmul.f32 %v1887_v42, %v1887_v42 }
 0x20c   :  { %v406_v33 = vpop.permute.xlu1 %405 }
 0x20d   :  { %v410_v52 = vadd.f32 %v406_v33, %v394_v4  ;;  %v602_v41 = vsel %vm583_vm1, %v1892_v38, 0.0  ;;  %v599_v35 = vsel %vm583_vm1, %v579_v8, 0.0  ;;  %v580_v9 = vmul.f32 %v1892_v38, %v1892_v38 }
 0x20e   :  { %603 = vadd.xlane.f32.xlu0 %v602_v41 }
 0x20f   :  { %v1896_v46 = vadd.f32 %v565_v39, %v410_v52  ;;  %v611_v61 = vsel %vm583_vm1, %v580_v9, 0.0 }
 0x210   :  { %v548_v47 = vpop.permute.xlu1 %547 }
 0x211   :  { %v552_v1 = vadd.f32 %v548_v47, %v536_v56  ;;  %v605_v7 = vsel %vm583_vm1, %v1896_v46, 0.0  ;;  %v581_v60 = vmul.f32 %v1896_v46, %v1896_v46 }
 0x212   :  { %606 = vadd.xlane.f32.xlu0 %v605_v7 }
 0x213   :  { %v1902_v18 = vadd.f32 %v569_v48, %v552_v1  ;;  %v614_v49 = vsel %vm583_vm1, %v581_v60, 0.0 }
 0x215   :  { %v608_v2 = vsel %vm583_vm1, %v1902_v18, 0.0  ;;  %v582_v34 = vmul.f32 %v1902_v18, %v1902_v18 }
 0x216   :  { %609 = vadd.xlane.f32.xlu1 %v608_v2  ;;  %594 = vadd.xlane.f32.xlu0 %v593_v51 }
 0x217   :  { %v617_v62 = vsel %vm583_vm1, %v582_v34, 0.0 }
 0x21a   :  { %597 = vadd.xlane.f32.xlu1 %v596_v63  ;;  %600 = vadd.xlane.f32.xlu0 %v599_v35 }
 0x21e   :  { %612 = vadd.xlane.f32.xlu1 %v611_v61  ;;  %615 = vadd.xlane.f32.xlu0 %v614_v49 }
 0x222   :  { %618 = vadd.xlane.f32.xlu1 %v617_v62 }
 0x28b   :  { %v586_v15 = vpop.xlane.xlu0 %585 }
 0x28c   :  { %v621_v19 = vsel %vm620_vm2, %v586_v15, 0.0 }
 0x28d   :  { %v622_v21 = vrot.slane %v621_v19, 4 }
 0x28f   :  { %v589_v20 = vpop.xlane.xlu1 %588  ;;  %v623_v54 = vadd.f32 %v622_v21, %v621_v19 }
 0x290   :  { %v628_v39 = vsel %vm620_vm2, %v589_v20, 0.0 }
 0x291   :  { %v629_v11 = vrot.slane %v628_v39, 4  ;;  %v624_v48 = vrot.slane %v623_v54, 2 }
 0x293   :  { %v592_v59 = vpop.xlane.xlu0 %591  ;;  %v630_v28 = vadd.f32 %v629_v11, %v628_v39  ;;  %v625_v44 = vadd.f32 %v624_v48, %v623_v54 }
 0x294   :  { %v635_v26 = vsel %vm620_vm2, %v592_v59, 0.0 }
 0x295   :  { %v636_v32 = vrot.slane %v635_v26, 4  ;;  %v631_v40 = vrot.slane %v630_v28, 2  ;;  %v626_v8 = vrot.slane %v625_v44, 1 }
 0x297   :  { %v604_v58 = vpop.xlane.xlu0 %603  ;;  %v637_v55 = vadd.f32 %v636_v32, %v635_v26  ;;  %v632_v22 = vadd.f32 %v631_v40, %v630_v28 }
 0x298   :  { %v663_v24 = vsel %vm620_vm2, %v604_v58, 0.0 }
 0x299   :  { %v664_v12 = vrot.slane %v663_v24, 4  ;;  %v638_v63 = vrot.slane %v637_v55, 2  ;;  %v633_v19 = vrot.slane %v632_v22, 1 }
 0x29b   :  { %v665_v53 = vadd.f32 %v664_v12, %v663_v24  ;;  %v607_v25 = vpop.xlane.xlu0 %606  ;;  %v627_v24 = vadd.f32 %v626_v8, %v625_v44  ;;  %v639_v11 = vadd.f32 %v638_v63, %v637_v55 }
 0x29c   :  { %v670_v0 = vsel %vm620_vm2, %v607_v25, 0.0 }
 0x29d   :  { %v671_v29 = vrot.slane %v670_v0, 4  ;;  %v666_v3 = vrot.slane %v665_v53, 2 }
 0x29f   :  { %v672_v14 = vadd.f32 %v671_v29, %v670_v0  ;;  %v610_v5 = vpop.xlane.xlu1 %609  ;;  %v595_v36 = vpop.xlane.xlu0 %594  ;;  %v667_v50 = vadd.f32 %v666_v3, %v665_v53  ;;  %v634_v29 = vadd.f32 %v633_v19, %v632_v22 }
 0x2a0   :  { %v677_v23 = vsel %vm620_vm2, %v610_v5, 0.0  ;;  %v642_v37 = vsel %vm620_vm2, %v595_v36, 0.0  ;;  %v640_v36 = vrot.slane %v639_v11, 1 }
 0x2a1   :  { %v673_v4 = vrot.slane %v672_v14, 2  ;;  %v678_v6 = vrot.slane %v677_v23, 4  ;;  %v643_v43 = vrot.slane %v642_v37, 4  ;;  %v668_v35 = vrot.slane %v667_v50, 1 }
 0x2a3   :  { %v674_v56 = vadd.f32 %v673_v4, %v672_v14  ;;  %v679_v33 = vadd.f32 %v678_v6, %v677_v23  ;;  %v598_v52 = vpop.xlane.xlu1 %597  ;;  %v601_v41 = vpop.xlane.xlu0 %600  ;;  %v644_v47 = vadd.f32 %v643_v43, %v642_v37  ;;  %v669_v12 = vadd.f32 %v668_v35, %v667_v50 }
 0x2a4   :  { %v649_v1 = vsel %vm620_vm2, %v598_v52, 0.0  ;;  %v656_v7 = vsel %vm620_vm2, %v601_v41, 0.0  ;;  %v641_v41 = vadd.f32 %v640_v36, %v639_v11  ;;  %v741_v36 = vstv %s1346_s13  ;;  %s1453_s13 = smov 1  }
 0x2a5   :  { %v680_v2 = vrot.slane %v679_v33, 2  ;;  %v650_v51 = vrot.slane %v649_v1, 4  ;;  %v657_v17 = vrot.slane %v656_v7, 4  ;;  %v675_v9 = vrot.slane %v674_v56, 1 }
 0x2a6   :  { %v645_v49 = vrot.slane %v644_v47, 2  ;;  %v705_v23 = vadd.f32 %v669_v12, %v627_v24 }
 0x2a7   :  { %v613_v60 = vpop.xlane.xlu1 %612  ;;  %v616_v61 = vpop.xlane.xlu0 %615  ;;  %v651_v34 = vadd.f32 %v650_v51, %v649_v1  ;;  %v681_v20 = vadd.f32 %v680_v2, %v679_v33  ;;  %v658_v59 = vadd.f32 %v657_v17, %v656_v7  ;;  %v676_v54 = vadd.f32 %v675_v9, %v674_v56 }
 0x2a8   :  { %v684_v62 = vsel %vm620_vm2, %v613_v60, 0.0  ;;  %v691_v15 = vsel %vm620_vm2, %v616_v61, 0.0  ;;  %v646_v25 = vadd.f32 %v645_v49, %v644_v47  ;;  %v711_v47 = vmul.f32 0.010204081, %v705_v23 }
 0x2a9   :  { %v652_v21 = vrot.slane %v651_v34, 2  ;;  %v685_v39 = vrot.slane %v684_v62, 4  ;;  %v692_v58 = vrot.slane %v691_v15, 4  ;;  %v682_v48 = vrot.slane %v681_v20, 1 }
 0x2aa   :  { %v659_v32 = vrot.slane %v658_v59, 2  ;;  %v706_v37 = vadd.f32 %v676_v54, %v634_v29  ;;  %v647_v4 = vrot.slane %v646_v25, 1  ;;  %v717_v49 = vmul.f32 %v711_v47, %v711_v47 }
 0x2ab   :  { %v619_v53 = vpop.xlane.xlu1 %618  ;;  %v653_v26 = vadd.f32 %v652_v21, %v651_v34  ;;  %v686_v0 = vadd.f32 %v685_v39, %v684_v62  ;;  %v693_v28 = vadd.f32 %v692_v58, %v691_v15  ;;  %v683_v55 = vadd.f32 %v682_v48, %v681_v20 }
 0x2ac   :  { %v698_v3 = vsel %vm620_vm2, %v619_v53, 0.0  ;;  %v660_v50 = vadd.f32 %v659_v32, %v658_v59  ;;  %v712_v1 = vmul.f32 0.010204081, %v706_v37  ;;  %v648_v22 = vadd.f32 %v647_v4, %v646_v25 }
 0x2ad   :  { %v687_v14 = vrot.slane %v686_v0, 2  ;;  %v694_v5 = vrot.slane %v693_v28, 2  ;;  %v699_v40 = vrot.slane %v698_v3, 4  ;;  %v654_v6 = vrot.slane %v653_v26, 1 }
 0x2ae   :  { %v707_v8 = vadd.f32 %v683_v55, %v641_v41  ;;  %v661_v63 = vrot.slane %v660_v50, 1  ;;  %v718_v34 = vmul.f32 %v712_v1, %v712_v1 }
 0x2af   :  { %v688_v43 = vadd.f32 %v687_v14, %v686_v0  ;;  %v695_v44 = vadd.f32 %v694_v5, %v693_v28  ;;  %v700_v56 = vadd.f32 %v699_v40, %v698_v3  ;;  %v655_v2 = vadd.f32 %v654_v6, %v653_v26 }
 0x2b0   :  { %v713_v19 = vmul.f32 0.010204081, %v707_v8  ;;  %v662_v20 = vadd.f32 %v661_v63, %v660_v50  ;;  %v724_v26 = vstv %s1342_s9  ;;  %v726_v0 = vstv %s1343_s10  ;;  %s2044_s9 = sld [smem:[#allocation2 + $0x29]] }
 0x2b1   :  { %v689_v33 = vrot.slane %v688_v43, 1  ;;  %v696_v52 = vrot.slane %v695_v44, 1  ;;  %v701_v7 = vrot.slane %v700_v56, 2  ;;  %v739_v3 = vstv %s1345_s12  ;;  %s1354_s10 = sld [smem:[#allocation2 + $0x24]] }
 0x2b2   :  { %v719_v12 = vmul.f32 %v713_v19, %v713_v19  ;;  %v728_v14 = vstv %s1344_s11  ;;  %s2048_s11 = sld [smem:[#allocation2 + $0x2c]] }
 0x2b3   :  { %v690_v51 = vadd.f32 %v689_v33, %v688_v43  ;;  %v697_v17 = vadd.f32 %v696_v52, %v695_v44  ;;  %v702_v35 = vadd.f32 %v701_v7, %v700_v56  ;;  %v743_v43 = vstv %s1347_s14  ;;  %s1356_s12 = sld [smem:[#allocation2 + $0x26]] }
 0x2b4   :  { %s1348_s14 = sld [smem:[#allocation2 + $0x39]] }
 0x2b5   :  { %v708_v9 = vadd.f32 %v690_v51, %v648_v22  ;;  %v709_v60 = vadd.f32 %v697_v17, %v655_v2  ;;  %v703_v61 = vrot.slane %v702_v35, 1 }
 0x2b7   :  { %v714_v62 = vmul.f32 0.010204081, %v708_v9  ;;  %v715_v15 = vmul.f32 0.010204081, %v709_v60  ;;  %v704_v59 = vadd.f32 %v703_v61, %v702_v35 }
 0x2b9   :  { %v720_v21 = vsub.f32 %v714_v62, %v717_v49  ;;  %v721_v39 = vsub.f32 %v715_v15, %v718_v34  ;;  %v710_v58 = vadd.f32 %v704_v59, %v662_v20  ;;  %v1434_v59 = vld [vmem:[%s2138_s0 + $0x10] sm:$0xff] }
 0x2bb   :  { %v729_v24 = vadd.f32 1e-05, %v720_v21  ;;  %v730_v11 = vadd.f32 1e-05, %v721_v39  ;;  %v716_v54 = vmul.f32 0.010204081, %v710_v58 }
 0x2bc   :  { %v1435_v39 = vld [vmem:[%s2138_s0 + $0x28] sm:$0xff] }
 0x2bd   :  { %1418 = vrsqrt.f32 %v729_v24  ;;  %v722_v53 = vsub.f32 %v716_v54, %v719_v12 }
 0x2be   :  { %1420 = vrsqrt.f32 %v730_v11 }
 0x2bf   :  { %v731_v25 = vadd.f32 1e-05, %v722_v53 }
 0x2c1   :  { %1422 = vrsqrt.f32 %v731_v25 }
 0x2ca   :  { %v1419_v28 = vpop.eup %1418 }
 0x2cb   :  { %v1421_v29 = vpop.eup %1420  ;;  %v735_v48 = vmul.f32 %v1419_v28, %v724_v26 }
 0x2cc   :  { %v736_v32 = vmul.f32 %v1421_v29, %v726_v0 }
 0x2cd   :  { %1366 = vpush %v735_v48  ;;  %v744_v5 = vmul.f32 %v735_v48, %v711_v47 }
 0x2ce   :  { %1368 = vpush %v736_v32  ;;  %v745_v23 = vmul.f32 %v736_v32, %v712_v1  ;;  %v1423_v37 = vpop.eup %1422 }
 0x2cf   :  { %v747_v40 = vsub.f32 %v739_v3, %v744_v5  ;;  %v737_v4 = vmul.f32 %v1423_v37, %v728_v14 }
 0x2d0   :  { %v748_v6 = vsub.f32 %v741_v36, %v745_v23 }
 0x2d1   :  { %1370 = vpush %v737_v4  ;;  %v746_v44 = vmul.f32 %v737_v4, %v713_v19 }
 0x2d2   :  { %1372 = vpush %v747_v40 }
 0x2d3   :  { %1374 = vpush %v748_v6  ;;  %v749_v55 = vsub.f32 %v743_v43, %v746_v44 }
 0x2d5   :  { %1376 = vpush %v749_v55 }
 0x2fe   :  { %s1367_s15 = spop %1366 }
 0x2ff   :  { %s1369_s1 = spop %1368  ;;  %v752_v50 = vstv %s1367_s15  ;;  %s1349_s15 = sld [smem:[#allocation2 + $0x3a]] }
 0x300   :  { %v756_v56 = vstv %s1369_s1  ;;  %v762_v33 = vmul.f32 %v752_v50, %v1863_v16  ;;  %v765_v52 = vmul.f32 %v752_v50, %v1892_v38  ;;  %v1430_v16 = vld [vmem:[%s2138_s0] sm:$0xff]  ;;  %s1351_s1 = sld [smem:[#allocation2 + $0x3c]] }
 0x301   :  { %v763_v47 = vmul.f32 %v756_v56, %v1875_v27  ;;  %v766_v1 = vmul.f32 %v756_v56, %v1896_v46  ;;  %v1431_v27 = vld [vmem:[%s2138_s0 + $0x18] sm:$0xff] }
 0x302   :  { %s1371_s16 = spop %1370 }
 0x303   :  { %v760_v41 = vstv %s1371_s16  ;;  %s1373_s17 = spop %1372  ;;  %s1350_s16 = sld [smem:[#allocation2 + $0x3b]] }
 0x304   :  { %v770_v7 = vstv %s1373_s17  ;;  %s1375_s18 = spop %1374  ;;  %v764_v17 = vmul.f32 %v760_v41, %v1887_v42  ;;  %v767_v8 = vmul.f32 %v760_v41, %v1902_v18  ;;  %v1432_v42 = vld [vmem:[%s2138_s0 + $0x8] sm:$0xff]  ;;  %v1433_v18 = vld [vmem:[%s2138_s0 + $0x20] sm:$0xff]  ;;  %s1452_s0 = smov 126  }
 0x305   :  { %v780_v22 = vadd.f32 %v770_v7, %v762_v33  ;;  %v783_v2 = vadd.f32 %v770_v7, %v765_v52  ;;  %v774_v51 = vstv %s1375_s18  ;;  %s1352_s17 = sld [smem:[#allocation2 + $0x3d]] }
 0x306   :  { %v781_v63 = vadd.f32 %v774_v51, %v763_v47  ;;  %v784_v35 = vadd.f32 %v774_v51, %v766_v1  ;;  %s1377_s19 = spop %1376  ;;  %s1353_s18 = sld [smem:[#allocation2 + $0x3e]] }
 0x307   :  { %v786_v38 = vadd.f32 %v1430_v16, %v780_v22  ;;  %v789_v46 = vadd.f32 %v1431_v27, %v783_v2  ;;  %v778_v9 = vstv %s1377_s19  ;;  %s2084_s19 = sld [smem:[#allocation2 + $0x36]] }
 0x308   :  { %v787_v60 = vadd.f32 %v1432_v42, %v781_v63  ;;  %v790_v61 = vadd.f32 %v1433_v18, %v784_v35  ;;  %v782_v49 = vadd.f32 %v778_v9, %v764_v17  ;;  %v785_v34 = vadd.f32 %v778_v9, %v767_v8 }
 0x309   :  { %v798_v62 = vrot.slane %v786_v38, 1  ;;  %v801_v15 = vrot.slane %v789_v46, 1 }
 0x30a   :  { %v799_v19 = vrot.slane %v787_v60, 1  ;;  %v802_v20 = vrot.slane %v790_v61, 1  ;;  %v788_v21 = vadd.f32 %v1434_v59, %v782_v49  ;;  %v791_v58 = vadd.f32 %v1435_v39, %v785_v34 }
 0x30b   :  { %v810_v24 = vmax.f32 %v786_v38, %v798_v62  ;;  %v813_v53 = vmax.f32 %v789_v46, %v801_v15 }
 0x30c   :  { %v811_v11 = vmax.f32 %v787_v60, %v799_v19  ;;  %v814_v12 = vmax.f32 %v790_v61, %v802_v20  ;;  %v800_v54 = vrot.slane %v788_v21, 1  ;;  %v803_v0 = vrot.slane %v791_v58, 1 }
 0x30d   :  { %v822_v25 = vrot.slane %v810_v24, 1  ;;  %v834_v26 = vrot.slane %v810_v24, 2  ;;  %v825_v44 = vrot.slane %v813_v53, 1  ;;  %v837_v56 = vrot.slane %v813_v53, 2 }
 0x30e   :  { %v812_v28 = vmax.f32 %v788_v21, %v800_v54  ;;  %v823_v29 = vrot.slane %v811_v11, 1  ;;  %v835_v48 = vrot.slane %v811_v11, 2  ;;  %v826_v3 = vrot.slane %v814_v12, 1 }
 0x30f   :  { %v847_v32 = vsel %vm846_vm3, %v810_v24, %v822_v25  ;;  %v838_v14 = vrot.slane %v814_v12, 2  ;;  %v815_v6 = vmax.f32 %v791_v58, %v803_v0  ;;  %v850_v33 = vsel %vm846_vm3, %v813_v53, %v825_v44 }
 0x310   :  { %v854_v5 = vsel %vm853_vm4, %v847_v32, %v834_v26  ;;  %v848_v36 = vsel %vm846_vm3, %v811_v11, %v823_v29  ;;  %v824_v23 = vrot.slane %v812_v28, 1  ;;  %v836_v37 = vrot.slane %v812_v28, 2 }
 0x311   :  { %866 = vrot.lane.b32.xlu0 %v854_v5, %s1451_s30  ;;  %v855_v40 = vsel %vm853_vm4, %v848_v36, %v835_v48  ;;  %v851_v4 = vsel %vm846_vm3, %v814_v12, %v826_v3  ;;  %v827_v52 = vrot.slane %v815_v6, 1  ;;  %v857_v41 = vsel %vm853_vm4, %v850_v33, %v837_v56 }
 0x312   :  { %868 = vrot.lane.b32.xlu1 %v855_v40, %s1451_s30  ;;  %v849_v43 = vsel %vm846_vm3, %v812_v28, %v824_v23  ;;  %v858_v50 = vsel %vm853_vm4, %v851_v4, %v838_v14  ;;  %v839_v47 = vrot.slane %v815_v6, 2 }
 0x313   :  { %v856_v55 = vsel %vm853_vm4, %v849_v43, %v836_v37  ;;  %v852_v1 = vsel %vm846_vm3, %v815_v6, %v827_v52 }
 0x314   :  { %v859_v7 = vsel %vm853_vm4, %v852_v1, %v839_v47  ;;  %v1172_v47 = vstv %s2036_s5 }
 0x315   :  { %874 = vrot.lane.b32.xlu0 %v858_v50, %s1451_s30 }
 0x316   :  { %870 = vrot.lane.b32.xlu1 %v856_v55, %s1451_s30 }
 0x31a   :  { %872 = vrot.lane.b32.xlu1 %v857_v41, %s1451_s30 }
 0x31e   :  { %876 = vrot.lane.b32.xlu1 %v859_v7, %s1451_s30 }
 0x383   :  { %v867_v22 = vpop.permute.xlu0 %866 }
 0x384   :  { %v884_v2 = vmax.f32 %v854_v5, %v867_v22  ;;  %v869_v51 = vpop.permute.xlu1 %868 }
 0x385   :  { %v885_v17 = vmax.f32 %v855_v40, %v869_v51  ;;  %v1182_v51 = vstv %s2044_s9 }
 0x386   :  { %896 = vrot.lane.b32.xlu0 %v884_v2, %s1451_s30 }
 0x387   :  { %898 = vrot.lane.b32.xlu1 %v885_v17, %s1451_s30  ;;  %v875_v35 = vpop.permute.xlu0 %874 }
 0x388   :  { %v871_v8 = vpop.permute.xlu1 %870  ;;  %v888_v38 = vmax.f32 %v858_v50, %v875_v35  ;;  %v1156_v35 = vstv %s1354_s10 }
 0x389   :  { %v886_v63 = vmax.f32 %v856_v55, %v871_v8 }
 0x38b   :  { %900 = vrot.lane.b32.xlu0 %v886_v63, %s1451_s30 }
 0x38c   :  { %v873_v16 = vpop.permute.xlu1 %872 }
 0x38d   :  { %v887_v27 = vmax.f32 %v857_v41, %v873_v16 }
 0x38f   :  { %904 = vrot.lane.b32.xlu0 %v888_v38, %s1451_s30  ;;  %902 = vrot.lane.b32.xlu1 %v887_v27, %s1451_s30 }
 0x390   :  { %v877_v46 = vpop.permute.xlu1 %876 }
 0x391   :  { %v889_v9 = vmax.f32 %v859_v7, %v877_v46  ;;  %v1192_v7 = vstv %s2042_s7  ;;  %v1198_v46 = vstv %s2048_s11 }
 0x393   :  { %914 = vrot.lane.b32.xlu0 %v884_v2, %s1452_s0  ;;  %906 = vrot.lane.b32.xlu1 %v889_v9, %s1451_s30  ;;  %s2034_s30 = sld [smem:[#allocation2 + $0x28]] }
 0x397   :  { %918 = vrot.lane.b32.xlu0 %v886_v63, %s1452_s0  ;;  %916 = vrot.lane.b32.xlu1 %v885_v17, %s1452_s0 }
 0x399   :  { %v1176_v41 = vstv %s2034_s30 }
 0x39b   :  { %922 = vrot.lane.b32.xlu0 %v888_v38, %s1452_s0  ;;  %920 = vrot.lane.b32.xlu1 %v887_v27, %s1452_s0 }
 0x39f   :  { %924 = vrot.lane.b32.xlu1 %v889_v9, %s1452_s0 }
 0x3f8   :  { %v897_v42 = vpop.permute.xlu0 %896 }
 0x3f9   :  { %v899_v60 = vpop.permute.xlu1 %898  ;;  %v933_v34 = vsel %vm932_vm5, %v884_v2, %v897_v42  ;;  %v1160_v2 = vstv %s1355_s8 }
 0x3fa   :  { %v934_v59 = vsel %vm932_vm5, %v885_v17, %v899_v60  ;;  %v1188_v17 = vstv %s2040_s6 }
 0x3fd   :  { %v901_v18 = vpop.permute.xlu0 %900 }
 0x3fe   :  { %v935_v21 = vsel %vm932_vm5, %v886_v63, %v901_v18  ;;  %v1166_v18 = vstv %s1356_s12 }
 0x401   :  { %v905_v61 = vpop.permute.xlu0 %904  ;;  %v903_v49 = vpop.permute.xlu1 %902 }
 0x402   :  { %v936_v53 = vsel %vm932_vm5, %v887_v27, %v903_v49  ;;  %v937_v28 = vsel %vm932_vm5, %v888_v38, %v905_v61 }
 0x405   :  { %v915_v62 = vpop.permute.xlu0 %914  ;;  %v907_v15 = vpop.permute.xlu1 %906 }
 0x406   :  { %v1984_v19 = vsel %vm939_vm6, %v933_v34, %v915_v62  ;;  %v938_v32 = vsel %vm932_vm5, %v889_v9, %v907_v15 }
 0x407   :  { %v953_v20 = vsel %vm952_vm7, %v1984_v19, 0.0  ;;  %v946_v23 = vmul.f32 %v1984_v19, %v1984_v19  ;;  %v1173_v22 = vmul.f32 %v1172_v47, %v1984_v19  ;;  %v1189_v27 = vmul.f32 %v1188_v17, %v1984_v19 }
 0x408   :  { %954 = vadd.xlane.f32.xlu0 %v953_v20  ;;  %v1157_v9 = vmul.f32 %v1156_v35, %v1984_v19 }
 0x409   :  { %v919_v39 = vpop.permute.xlu0 %918  ;;  %v917_v58 = vpop.permute.xlu1 %916  ;;  %v962_v40 = vsel %vm952_vm7, %v946_v23, 0.0 }
 0x40a   :  { %v1991_v24 = vsel %vm939_vm6, %v935_v21, %v919_v39  ;;  %v1994_v11 = vsel %vm939_vm6, %v934_v59, %v917_v58 }
 0x40b   :  { %v959_v12 = vsel %vm952_vm7, %v1991_v24, 0.0  ;;  %v956_v54 = vsel %vm952_vm7, %v1994_v11, 0.0  ;;  %v947_v37 = vmul.f32 %v1994_v11, %v1994_v11  ;;  %v948_v6 = vmul.f32 %v1991_v24, %v1991_v24 }
 0x40c   :  { %960 = vadd.xlane.f32.xlu0 %v959_v12  ;;  %957 = vadd.xlane.f32.xlu1 %v956_v54  ;;  %v1177_v1 = vmul.f32 %v1176_v41, %v1994_v11  ;;  %v1193_v63 = vmul.f32 %v1192_v7, %v1994_v11  ;;  %v1161_v16 = vmul.f32 %v1160_v2, %v1994_v11 }
 0x40d   :  { %v923_v25 = vpop.permute.xlu0 %922  ;;  %v921_v26 = vpop.permute.xlu1 %920  ;;  %v965_v4 = vsel %vm952_vm7, %v947_v37, 0.0  ;;  %v968_v44 = vsel %vm952_vm7, %v948_v6, 0.0  ;;  %v1183_v38 = vmul.f32 %v1182_v51, %v1991_v24  ;;  %v1199_v49 = vmul.f32 %v1198_v46, %v1991_v24 }
 0x40e   :  { %v2002_v0 = vsel %vm939_vm6, %v936_v53, %v921_v26  ;;  %v2008_v48 = vsel %vm939_vm6, %v937_v28, %v923_v25  ;;  %v1179_v8 = vadd.f32 %v1177_v1, %v1173_v22  ;;  %v1195_v60 = vadd.f32 %v1193_v63, %v1189_v27 }
 0x40f   :  { %v971_v29 = vsel %vm952_vm7, %v2002_v0, 0.0  ;;  %v974_v5 = vsel %vm952_vm7, %v2008_v48, 0.0  ;;  %v949_v43 = vmul.f32 %v2002_v0, %v2002_v0  ;;  %v950_v50 = vmul.f32 %v2008_v48, %v2008_v48 }
 0x410   :  { %972 = vadd.xlane.f32.xlu0 %v971_v29  ;;  %v1185_v42 = vadd.f32 %v1183_v38, %v1179_v8  ;;  %v1163_v61 = vadd.f32 %v1161_v16, %v1157_v9  ;;  %v1158_v34 = vmul.f32 %v1156_v35, %v2002_v0  ;;  %v1162_v62 = vmul.f32 %v1160_v2, %v2008_v48 }
 0x411   :  { %v925_v3 = vpop.permute.xlu1 %924  ;;  %v980_v55 = vsel %vm952_vm7, %v949_v43, 0.0  ;;  %v983_v33 = vsel %vm952_vm7, %v950_v50, 0.0  ;;  %v1167_v15 = vmul.f32 %v1166_v18, %v1991_v24  ;;  %v1174_v20 = vmul.f32 %v1172_v47, %v2002_v0 }
 0x412   :  { %v2012_v14 = vsel %vm939_vm6, %v938_v32, %v925_v3  ;;  %v1178_v59 = vmul.f32 %v1176_v41, %v2008_v48  ;;  %v1201_v21 = vadd.f32 %v1199_v49, %v1195_v60  ;;  %v1164_v54 = vadd.f32 %v1162_v62, %v1158_v34 }
 0x413   :  { %v977_v36 = vsel %vm952_vm7, %v2012_v14, 0.0  ;;  %v951_v56 = vmul.f32 %v2012_v14, %v2012_v14  ;;  %v1168_v39 = vmul.f32 %v1166_v18, %v2012_v14  ;;  %v1169_v58 = vadd.f32 %v1167_v15, %v1163_v61 }
 0x414   :  { %975 = vadd.xlane.f32.xlu0 %v974_v5  ;;  %978 = vadd.xlane.f32.xlu1 %v977_v36  ;;  %v1184_v12 = vmul.f32 %v1182_v51, %v2012_v14  ;;  %v1190_v53 = vmul.f32 %v1188_v17, %v2002_v0  ;;  %v1194_v25 = vmul.f32 %v1192_v7, %v2008_v48 }
 0x415   :  { %v986_v52 = vsel %vm952_vm7, %v951_v56, 0.0  ;;  %v1180_v26 = vadd.f32 %v1178_v59, %v1174_v20  ;;  %v1170_v28 = vadd.f32 %v1168_v39, %v1164_v54  ;;  %v1200_v29 = vmul.f32 %v1198_v46, %v2012_v14 }
 0x416   :  { %v1196_v3 = vadd.f32 %v1194_v25, %v1190_v53 }
 0x417   :  { %v1186_v32 = vadd.f32 %v1184_v12, %v1180_v26 }
 0x418   :  { %963 = vadd.xlane.f32.xlu0 %v962_v40  ;;  %966 = vadd.xlane.f32.xlu1 %v965_v4  ;;  %v1202_v5 = vadd.f32 %v1200_v29, %v1196_v3 }
 0x41c   :  { %969 = vadd.xlane.f32.xlu0 %v968_v44  ;;  %981 = vadd.xlane.f32.xlu1 %v980_v55 }
 0x420   :  { %984 = vadd.xlane.f32.xlu0 %v983_v33  ;;  %987 = vadd.xlane.f32.xlu1 %v986_v52 }
 0x431   :  { %1211 = vrot.lane.b32.xlu1 %v1185_v42, %s1453_s13 }
 0x435   :  { %1213 = vrot.lane.b32.xlu1 %v1201_v21, %s1453_s13 }
 0x436   :  { %1209 = vrot.lane.b32.xlu0 %v1169_v58, %s1453_s13 }
 0x439   :  { %1215 = vrot.lane.b32.xlu1 %v1170_v28, %s1453_s13 }
 0x43a   :  { %1217 = vrot.lane.b32.xlu0 %v1186_v32, %s1453_s13 }
 0x43d   :  { %1219 = vrot.lane.b32.xlu1 %v1202_v5, %s1453_s13 }
 0x491   :  { %v955_v36 = vpop.xlane.xlu0 %954 }
 0x492   :  { %v990_v23 = vsel %vm989_vm8, %v955_v36, 0.0 }
 0x493   :  { %v991_v37 = vrot.slane %v990_v23, 4 }
 0x495   :  { %v961_v40 = vpop.xlane.xlu0 %960  ;;  %v958_v4 = vpop.xlane.xlu1 %957  ;;  %v992_v6 = vadd.f32 %v991_v37, %v990_v23 }
 0x496   :  { %v997_v43 = vsel %vm989_vm8, %v958_v4, 0.0  ;;  %v1004_v50 = vsel %vm989_vm8, %v961_v40, 0.0 }
 0x497   :  { %v998_v56 = vrot.slane %v997_v43, 4  ;;  %v993_v52 = vrot.slane %v992_v6, 2  ;;  %v1005_v7 = vrot.slane %v1004_v50, 4 }
 0x499   :  { %v973_v44 = vpop.xlane.xlu0 %972  ;;  %v999_v51 = vadd.f32 %v998_v56, %v997_v43  ;;  %v994_v63 = vadd.f32 %v993_v52, %v992_v6  ;;  %v1006_v9 = vadd.f32 %v1005_v7, %v1004_v50 }
 0x49a   :  { %v1032_v55 = vsel %vm989_vm8, %v973_v44, 0.0 }
 0x49b   :  { %v1033_v33 = vrot.slane %v1032_v55, 4  ;;  %v1000_v61 = vrot.slane %v999_v51, 2  ;;  %v995_v15 = vrot.slane %v994_v63, 1  ;;  %v1007_v26 = vrot.slane %v1006_v9, 2 }
 0x49d   :  { %v1034_v41 = vadd.f32 %v1033_v33, %v1032_v55  ;;  %v976_v47 = vpop.xlane.xlu0 %975  ;;  %v979_v1 = vpop.xlane.xlu1 %978  ;;  %v1001_v28 = vadd.f32 %v1000_v61, %v999_v51  ;;  %v996_v36 = vadd.f32 %v995_v15, %v994_v63  ;;  %v1008_v56 = vadd.f32 %v1007_v26, %v1006_v9 }
 0x49e   :  { %v1039_v22 = vsel %vm989_vm8, %v976_v47, 0.0  ;;  %v1046_v2 = vsel %vm989_vm8, %v979_v1, 0.0 }
 0x49f   :  { %v1035_v17 = vrot.slane %v1034_v41, 2  ;;  %v1040_v8 = vrot.slane %v1039_v22, 4  ;;  %v1047_v35 = vrot.slane %v1046_v2, 4  ;;  %v1002_v33 = vrot.slane %v1001_v28, 1 }
 0x4a1   :  { %v1036_v16 = vadd.f32 %v1035_v17, %v1034_v41  ;;  %v1041_v38 = vadd.f32 %v1040_v8, %v1039_v22  ;;  %v964_v27 = vpop.xlane.xlu0 %963  ;;  %v967_v46 = vpop.xlane.xlu1 %966  ;;  %v1048_v42 = vadd.f32 %v1047_v35, %v1046_v2  ;;  %v1009_v35 = vrot.slane %v1008_v56, 1 }
 0x4a2   :  { %v1011_v60 = vsel %vm989_vm8, %v964_v27, 0.0  ;;  %v1018_v18 = vsel %vm989_vm8, %v967_v46, 0.0 }
 0x4a3   :  { %v1042_v49 = vrot.slane %v1041_v38, 2  ;;  %v1012_v34 = vrot.slane %v1011_v60, 4  ;;  %v1019_v62 = vrot.slane %v1018_v18, 4  ;;  %v1037_v20 = vrot.slane %v1036_v16, 1 }
 0x4a4   :  { %v1049_v21 = vrot.slane %v1048_v42, 2 }
 0x4a5   :  { %v1043_v59 = vadd.f32 %v1042_v49, %v1041_v38  ;;  %v1013_v39 = vadd.f32 %v1012_v34, %v1011_v60  ;;  %v1020_v58 = vadd.f32 %v1019_v62, %v1018_v18  ;;  %v970_v12 = vpop.xlane.xlu0 %969  ;;  %v982_v54 = vpop.xlane.xlu1 %981  ;;  %v1038_v32 = vadd.f32 %v1037_v20, %v1036_v16 }
 0x4a6   :  { %v1025_v53 = vsel %vm989_vm8, %v970_v12, 0.0  ;;  %v1053_v25 = vsel %vm989_vm8, %v982_v54, 0.0  ;;  %v1050_v37 = vadd.f32 %v1049_v21, %v1048_v42  ;;  %v1003_v16 = vadd.f32 %v1002_v33, %v1001_v28 }
 0x4a7   :  { %v1014_v29 = vrot.slane %v1013_v39, 2  ;;  %v1026_v3 = vrot.slane %v1025_v53, 4  ;;  %v1054_v5 = vrot.slane %v1053_v25, 4  ;;  %v1044_v23 = vrot.slane %v1043_v59, 1 }
 0x4a8   :  { %v1021_v40 = vrot.slane %v1020_v58, 2  ;;  %v1074_v52 = vadd.f32 %v1038_v32, %v996_v36  ;;  %v1051_v7 = vrot.slane %v1050_v37, 1  ;;  %v1010_v20 = vadd.f32 %v1009_v35, %v1008_v56 }
 0x4a9   :  { %v985_v4 = vpop.xlane.xlu0 %984  ;;  %v1015_v6 = vadd.f32 %v1014_v29, %v1013_v39  ;;  %v1027_v43 = vadd.f32 %v1026_v3, %v1025_v53  ;;  %v1055_v44 = vadd.f32 %v1054_v5, %v1053_v25  ;;  %v988_v50 = vpop.xlane.xlu1 %987  ;;  %v1045_v1 = vadd.f32 %v1044_v23, %v1043_v59 }
 0x4aa   :  { %v1060_v55 = vsel %vm989_vm8, %v985_v4, 0.0  ;;  %v1067_v2 = vsel %vm989_vm8, %v988_v50, 0.0  ;;  %v1022_v17 = vadd.f32 %v1021_v40, %v1020_v58  ;;  %v1080_v27 = vmul.f32 0.055555556, %v1074_v52 }
 0x4ab   :  { %v1056_v41 = vrot.slane %v1055_v44, 2  ;;  %v1061_v47 = vrot.slane %v1060_v55, 4  ;;  %v1028_v22 = vrot.slane %v1027_v43, 2  ;;  %v1016_v51 = vrot.slane %v1015_v6, 1 }
 0x4ac   :  { %v1068_v38 = vrot.slane %v1067_v2, 4  ;;  %v1075_v9 = vadd.f32 %v1045_v1, %v1003_v16  ;;  %v1052_v60 = vadd.f32 %v1051_v7, %v1050_v37  ;;  %v1023_v34 = vrot.slane %v1022_v17, 1 }
 0x4ad   :  { %v1057_v8 = vadd.f32 %v1056_v41, %v1055_v44  ;;  %v1062_v63 = vadd.f32 %v1061_v47, %v1060_v55  ;;  %v1029_v18 = vadd.f32 %v1028_v22, %v1027_v43  ;;  %v1017_v49 = vadd.f32 %v1016_v51, %v1015_v6 }
 0x4ae   :  { %v1069_v61 = vadd.f32 %v1068_v38, %v1067_v2  ;;  %v1086_v58 = vmul.f32 %v1080_v27, %v1080_v27  ;;  %v1076_v12 = vadd.f32 %v1052_v60, %v1010_v20  ;;  %v1081_v25 = vmul.f32 0.055555556, %v1075_v9 }
 0x4af   :  { %v1058_v46 = vrot.slane %v1057_v8, 1  ;;  %v1063_v42 = vrot.slane %v1062_v63, 2  ;;  %v1030_v54 = vrot.slane %v1029_v18, 1  ;;  %v1024_v26 = vadd.f32 %v1023_v34, %v1022_v17 }
 0x4b0   :  { %v1070_v59 = vrot.slane %v1069_v61, 2  ;;  %v1082_v36 = vmul.f32 0.055555556, %v1076_v12  ;;  %v1087_v40 = vmul.f32 %v1081_v25, %v1081_v25  ;;  %v1093_v41 = vstv %s1348_s14 }
 0x4b1   :  { %v1059_v62 = vadd.f32 %v1058_v46, %v1057_v8  ;;  %v1064_v15 = vadd.f32 %v1063_v42, %v1062_v63  ;;  %v1031_v23 = vadd.f32 %v1030_v54, %v1029_v18  ;;  %v1095_v7 = vstv %s1349_s15 }
 0x4b2   :  { %v1071_v53 = vadd.f32 %v1070_v59, %v1069_v61  ;;  %v1088_v55 = vmul.f32 %v1082_v36, %v1082_v36  ;;  %v1108_v51 = vstv %s1351_s1  ;;  %v1097_v8 = vstv %s1350_s16  ;;  %v1212_v61 = vpop.permute.xlu1 %1211 }
 0x4b3   :  { %v1077_v21 = vadd.f32 %v1059_v62, %v1017_v49  ;;  %v1065_v39 = vrot.slane %v1064_v15, 1  ;;  %v1110_v63 = vstv %s1352_s17  ;;  %v1112_v9 = vstv %s1353_s18  ;;  %v1210_v49 = vpop.permute.xlu0 %1209 }
 0x4b4   :  { %v1072_v32 = vrot.slane %v1071_v53, 1  ;;  %v1228_v20 = vsel %vm932_vm5, 0.0, %v1212_v61 }
 0x4b5   :  { %v1083_v28 = vmul.f32 0.055555556, %v1077_v21  ;;  %v1066_v29 = vadd.f32 %v1065_v39, %v1064_v15  ;;  %v1227_v15 = vsel %vm932_vm5, 0.0, %v1210_v49  ;;  %v1240_v12 = vrot.slane %v1228_v20, 7 }
 0x4b6   :  { %v1073_v37 = vadd.f32 %v1072_v32, %v1071_v53 }
 0x4b7   :  { %v1089_v3 = vsub.f32 %v1083_v28, %v1086_v58  ;;  %v1078_v5 = vadd.f32 %v1066_v29, %v1024_v26  ;;  %v1218_v62 = vpop.permute.xlu0 %1217  ;;  %v1239_v58 = vrot.slane %v1227_v15, 7  ;;  %v1265_v28 = vstv %s2084_s19 }
 0x4b8   :  { %v1079_v43 = vadd.f32 %v1073_v37, %v1031_v23  ;;  %v1231_v59 = vsel %vm932_vm5, 0.0, %v1218_v62  ;;  %v1273_v37 = vstv %s2089_s21 }
 0x4b9   :  { %v1098_v4 = vadd.f32 1e-05, %v1089_v3  ;;  %v1084_v6 = vmul.f32 0.055555556, %v1078_v5  ;;  %v1243_v54 = vrot.slane %v1231_v59, 7  ;;  %v1251_v32 = vsel %vm846_vm3, 0.0, %v1239_v58 }
 0x4ba   :  { %v1085_v50 = vmul.f32 0.055555556, %v1079_v43  ;;  %v1269_v3 = vstv %s1364_s20  ;;  %v1252_v5 = vsel %vm846_vm3, 0.0, %v1240_v12 }
 0x4bb   :  { %1424 = vrsqrt.f32 %v1098_v4  ;;  %v1090_v44 = vsub.f32 %v1084_v6, %v1087_v40  ;;  %v1275_v4 = vadd.f32 %v1265_v28, %v1251_v32  ;;  %v1276_v6 = vadd.f32 %v1269_v3, %v1252_v5 }
 0x4bc   :  { %v1091_v33 = vsub.f32 %v1085_v50, %v1088_v55 }
 0x4bd   :  { %v1099_v56 = vadd.f32 1e-05, %v1090_v44 }
 0x4be   :  { %v1100_v52 = vadd.f32 1e-05, %v1091_v33 }
 0x4bf   :  { %1426 = vrsqrt.f32 %v1099_v56 }
 0x4c0   :  { %1428 = vrsqrt.f32 %v1100_v52 }
 0x4c8   :  { %v1425_v47 = vpop.eup %1424 }
 0x4c9   :  { %v1104_v1 = vmul.f32 %v1425_v47, %v1093_v41  ;;  %v1281_v41 = vmul.f32 %v1275_v4, %v1540_v57  ;;  %v1282_v47 = vmul.f32 %v1276_v6, %v1555_v13 }
 0x4cb   :  { %1378 = vpush %v1104_v1  ;;  %v1113_v22 = vmul.f32 %v1104_v1, %v1080_v27  ;;  %v1214_v27 = vpop.permute.xlu1 %1213 }
 0x4cc   :  { %v1427_v2 = vpop.eup %1426  ;;  %v1229_v21 = vsel %vm932_vm5, 0.0, %v1214_v27 }
 0x4cd   :  { %v1105_v17 = vmul.f32 %v1427_v2, %v1095_v7  ;;  %v1429_v35 = vpop.eup %1428  ;;  %v1116_v16 = vsub.f32 %v1108_v51, %v1113_v22 }
 0x4ce   :  { %v1106_v46 = vmul.f32 %v1429_v35, %v1097_v8 }
 0x4cf   :  { %1380 = vpush %v1105_v17  ;;  %v1114_v38 = vmul.f32 %v1105_v17, %v1081_v25  ;;  %v1216_v34 = vpop.permute.xlu1 %1215  ;;  %v1241_v25 = vrot.slane %v1229_v21, 7 }
 0x4d0   :  { %1382 = vpush %v1106_v46  ;;  %v1115_v60 = vmul.f32 %v1106_v46, %v1082_v36  ;;  %v1230_v53 = vsel %vm932_vm5, 0.0, %v1216_v34  ;;  %v1255_v36 = vsel %vm846_vm3, 0.0, %v1243_v54 }
 0x4d1   :  { %v1117_v42 = vsub.f32 %v1110_v63, %v1114_v38  ;;  %1384 = vpush %v1116_v16  ;;  %v1242_v29 = vrot.slane %v1230_v53, 7  ;;  %v1253_v40 = vsel %vm846_vm3, 0.0, %v1241_v25  ;;  %v1279_v43 = vadd.f32 %v1269_v3, %v1255_v36 }
 0x4d2   :  { %v1118_v18 = vsub.f32 %v1112_v9, %v1115_v60  ;;  %v1277_v55 = vadd.f32 %v1273_v37, %v1253_v40 }
 0x4d3   :  { %1386 = vpush %v1117_v42  ;;  %v1220_v39 = vpop.permute.xlu1 %1219  ;;  %v1254_v44 = vsel %vm846_vm3, 0.0, %v1242_v29  ;;  %v1285_v1 = vmul.f32 %v1279_v43, %v1585_v30 }
 0x4d4   :  { %1388 = vpush %v1118_v18  ;;  %v1232_v26 = vsel %vm932_vm5, 0.0, %v1220_v39  ;;  %v1278_v33 = vadd.f32 %v1265_v28, %v1254_v44  ;;  %v1283_v35 = vmul.f32 %v1277_v55, %v1588_v31 }
 0x4d5   :  { %v1244_v23 = vrot.slane %v1232_v26, 7 }
 0x4d6   :  { %v1284_v13 = vmul.f32 %v1278_v33, %v1552_v10 }
 0x4d7   :  { %v1256_v50 = vsel %vm846_vm3, 0.0, %v1244_v23 }
 0x4d8   :  { %v1280_v7 = vadd.f32 %v1273_v37, %v1256_v50 }
 0x4fc   :  { %s1379_s22 = spop %1378 }
 0x4fd   :  { %v1121_v56 = vstv %s1379_s22 }
 0x4fe   :  { %v1131_v22 = vmul.f32 %v1121_v56, %v1984_v19  ;;  %v1134_v2 = vmul.f32 %v1121_v56, %v2002_v0 }
 0x500   :  { %s1381_s23 = spop %1380 }
 0x501   :  { %v1125_v52 = vstv %s1381_s23  ;;  %s1383_s24 = spop %1382 }
 0x502   :  { %v1129_v51 = vstv %s1383_s24  ;;  %s1385_s25 = spop %1384  ;;  %v1132_v17 = vmul.f32 %v1125_v52, %v1994_v11  ;;  %v1135_v8 = vmul.f32 %v1125_v52, %v2008_v48  ;;  %v1286_v48 = vmul.f32 %v1280_v7, %v1621_v45 }
 0x503   :  { %v1139_v63 = vstv %s1385_s25  ;;  %v1133_v38 = vmul.f32 %v1129_v51, %v1991_v24  ;;  %v1136_v19 = vmul.f32 %v1129_v51, %v2012_v14 }
 0x504   :  { %s1387_s26 = spop %1386  ;;  %v1149_v57 = vadd.f32 %v1139_v63, %v1131_v22  ;;  %v1152_v16 = vadd.f32 %v1139_v63, %v1134_v2 }
 0x505   :  { %v1143_v30 = vstv %s1387_s26  ;;  %s1389_s27 = spop %1388 }
 0x506   :  { %v1150_v0 = vadd.f32 %v1143_v30, %v1132_v17  ;;  %v1153_v46 = vadd.f32 %v1143_v30, %v1135_v8  ;;  %v1287_v42 = vadd.f32 %v1281_v41, %v1149_v57  ;;  %v1290_v11 = vadd.f32 %v1284_v13, %v1152_v16 }
 0x507   :  { %v1147_v9 = vstv %s1389_s27 }
 0x508   :  { %v1288_v60 = vadd.f32 %v1282_v47, %v1150_v0  ;;  %v1291_v18 = vadd.f32 %v1285_v1, %v1153_v46  ;;  %v1151_v31 = vadd.f32 %v1147_v9, %v1133_v38  ;;  %v1154_v61 = vadd.f32 %v1147_v9, %v1136_v19  ;;  %1293 = vst.msk [vmem:[%s2140_s2] sm:$0x7] %vm952_vm7, %v1287_v42 }
 0x509   :  { %1296 = vst.msk [vmem:[%s2140_s2 + $0xc] sm:$0x7] %vm952_vm7, %v1290_v11 }
 0x50a   :  { %1294 = vst.msk [vmem:[%s2140_s2 + $0x4] sm:$0x7] %vm952_vm7, %v1288_v60  ;;  %1297 = vst.msk [vmem:[%s2140_s2 + $0x10] sm:$0x7] %vm952_vm7, %v1291_v18  ;;  %v1289_v10 = vadd.f32 %v1283_v35, %v1151_v31  ;;  %v1292_v45 = vadd.f32 %v1286_v48, %v1154_v61 }
 0x50c   :  { %1295 = vst.msk [vmem:[%s2140_s2 + $0x8] sm:$0x7] %vm952_vm7, %v1289_v10  ;;  %1298 = vst.msk [vmem:[%s2140_s2 + $0x14] sm:$0x7] %vm952_vm7, %v1292_v45 }
 0x50d   :  { %1303 = vsyncpa [#allocation3], 1 }

</bundles_post_ra>
